<compile_context>
chip_gen: v7x
topology: tpu7x:2x2x1
jax: 0.10.0
libtpu: 0.0.40
codegen_flags: <defaults>
</compile_context>

<pallas_src>
import functools

import jax
import jax.numpy as jnp
from jax import lax
from jax.experimental import pallas as pl
from jax.experimental.pallas import tpu as pltpu


# ------------------------------ sizing helpers --------------------------------

_LANE = 128


def _round_up(n, k):
    return ((n + k - 1) // k) * k


def _pick_chunk(n, candidates):
    """Largest candidate that divides n, else n (full extent)."""
    for c in candidates:
        if n % c == 0:
            return c
    return n


def _pick_batch_tile(B):
    """Largest batch tile that still yields >=2 grid programs (so v7x's two
    TensorCores both get work) with >=8 sublanes per tile; else whole batch."""
    for bt in (512, 256, 128, 64, 32, 16, 8):
        if B % bt == 0 and B // bt >= 2:
            return bt
    return B


_VMEM_CACHE = {}


def _vmem_limit_bytes():
    """Per-generation VMEM budget: ~75% of physical (48 MiB on v7x's 64 MiB,
    96 MiB on v5e/v6e's 128 MiB). Falls back to 48 MiB if the query fails."""
    if "limit" not in _VMEM_CACHE:
        cap = 64 * 1024 * 1024
        try:
            info = pltpu.get_tpu_info()
            cap = int(getattr(info, "vmem_capacity_bytes", cap) or cap)
        except Exception:
            pass
        _VMEM_CACHE["limit"] = (cap // 4) * 3
    return _VMEM_CACHE["limit"]


def _recurrence_tiles(B, P, Hp):
    """(batch_tile, time_chunk) for the recurrence under the VMEM budget:
    2*tb*bt*4Hp (gates, bf16) + 2*tb*bt*Hp (r_out, bf16) + 2*Hp*4Hp (W_hh,
    bf16) + 2*bt*Hp*4 (h/c f32 scratch) must fit with headroom."""
    budget = int(_vmem_limit_bytes() * 0.8)
    bt = _pick_batch_tile(B)
    tb = _pick_chunk(P, (64, 32, 16, 8))

    def need(bt_, tb_):
        return (2 * tb_ * bt_ * 4 * Hp * 2 + 2 * tb_ * bt_ * Hp * 2
                + 2 * Hp * 4 * Hp * 2 + 2 * bt_ * Hp * 4)

    while need(bt, tb) > budget and tb > 8 and tb % 2 == 0 and P % (tb // 2) == 0:
        tb //= 2
    while need(bt, tb) > budget and bt > 8 and bt % 2 == 0 and B % (bt // 2) == 0:
        bt //= 2
    return bt, tb


# ------------------------- 1) hoisted input projection ------------------------

def _input_proj_kernel(x_ref, w_ref, b_ref, o_ref):
    y = jnp.dot(x_ref[...], w_ref[...], preferred_element_type=jnp.float32)
    o_ref[...] = (y + b_ref[...]).astype(o_ref.dtype)


def input_proj_pallas(x2d, w_ih, b):
    """x2d: (R, m) bf16 time-major rows; w_ih: (m, 4Hp) bf16; b: (1, 4Hp) f32
    -> gates (R, 4Hp) bf16. One large, fully parallel MXU matmul."""
    R, m = x2d.shape
    G = w_ih.shape[1]
    tm = _pick_chunk(R, (1024, 512, 256, 128))
    return pl.pallas_call(
        _input_proj_kernel,
        out_shape=jax.ShapeDtypeStruct((R, G), jnp.bfloat16),
        grid_spec=pltpu.PrefetchScalarGridSpec(
            num_scalar_prefetch=0,
            grid=(R // tm,),
            in_specs=[
                pl.BlockSpec((tm, m), lambda i: (i, 0)),
                pl.BlockSpec((m, G), lambda i: (0, 0)),
                pl.BlockSpec((1, G), lambda i: (0, 0)),
            ],
            out_specs=pl.BlockSpec((tm, G), lambda i: (i, 0)),
        ),
        compiler_params=pltpu.CompilerParams(
            dimension_semantics=("parallel",),
            vmem_limit_bytes=_vmem_limit_bytes()),
    )(x2d, w_ih, b)


# ------------------------------ 2) LSTM recurrence -----------------------------

def _lstm_recurrence_kernel(gx_ref, whh_ref, rout_ref, h_ref, c_ref):
    # gx_ref: (tb, bt, 4Hp) bf16 time-major; rout_ref: (tb, bt, Hp) bf16;
    # h_ref/c_ref: (bt, Hp) f32 state, resident in VMEM across time chunks.
    @pl.when(pl.program_id(1) == 0)
    def _():
        h_ref[...] = jnp.zeros_like(h_ref)
        c_ref[...] = jnp.zeros_like(c_ref)

    Hp = h_ref.shape[-1]
    t_blk = gx_ref.shape[0]
    whh = whh_ref[...]                                   # resident bf16 weights

    def step(t, carry):
        h, c = carry                                     # f32 (bt, Hp)
        gates = gx_ref[t].astype(jnp.float32) + jnp.dot(
            h.astype(jnp.bfloat16), whh, preferred_element_type=jnp.float32)
        # sigmoid(x) = 0.5*(tanh(0.5x)+1): one EUP push for the contiguous,
        # lane-aligned (i, f, o) slab.
        sig = 0.5 * (jnp.tanh(0.5 * gates[:, :3 * Hp]) + 1.0)
        i_g = sig[:, 0 * Hp:1 * Hp]
        f_g = sig[:, 1 * Hp:2 * Hp]
        o_g = sig[:, 2 * Hp:3 * Hp]
        g_g = jnp.tanh(gates[:, 3 * Hp:])
        c = f_g * c + i_g * g_g
        h = o_g * jnp.tanh(c)
        rout_ref[t] = h.astype(rout_ref.dtype)           # dense (bt, Hp) slab
        return h, c

    unroll = True if t_blk <= 16 else 4
    h, c = lax.fori_loop(0, t_blk, step, (h_ref[...], c_ref[...]),
                         unroll=unroll)
    h_ref[...] = h
    c_ref[...] = c


def lstm_recurrence_pallas(gates_tm, w_hh, *, batch_tile=None, time_chunk=None):
    """gates_tm: (P, B, 4Hp) bf16; w_hh: (Hp, 4Hp) bf16 -> r (P, B, Hp) bf16."""
    P, B, G = gates_tm.shape
    Hp = w_hh.shape[0]
    assert G == 4 * Hp
    bt_d, tb_d = _recurrence_tiles(B, P, Hp)
    bt = batch_tile if batch_tile is not None else bt_d
    tb = time_chunk if time_chunk is not None else tb_d
    assert B % bt == 0 and P % tb == 0, "tiles must divide batch / window"
    return pl.pallas_call(
        _lstm_recurrence_kernel,
        out_shape=jax.ShapeDtypeStruct((P, B, Hp), jnp.bfloat16),
        grid_spec=pltpu.PrefetchScalarGridSpec(
            num_scalar_prefetch=0,
            grid=(B // bt, P // tb),              # serial time axis last
            in_specs=[
                pl.BlockSpec((tb, bt, G), lambda b, t: (t, b, 0)),
                pl.BlockSpec((Hp, G), lambda b, t: (0, 0)),
            ],
            out_specs=pl.BlockSpec((tb, bt, Hp), lambda b, t: (t, b, 0)),
            scratch_shapes=[
                pltpu.VMEM((bt, Hp), jnp.float32),    # h state
                pltpu.VMEM((bt, Hp), jnp.float32),    # c state
            ],
        ),
        compiler_params=pltpu.CompilerParams(
            dimension_semantics=("parallel", "arbitrary"),
            vmem_limit_bytes=_vmem_limit_bytes()),
    )(gates_tm, w_hh)


# ----------------------- 3) K-tiled Linear + output_fun ------------------------

def _linear_out_kernel(r_ref, w_ref, b_ref, o_ref, acc_ref, *, output_fun):
    k = pl.program_id(1)

    @pl.when(k == 0)
    def _():
        acc_ref[...] = jnp.zeros_like(acc_ref)

    tpl = r_ref.shape[0]

    def body(p, acc):
        return acc + jnp.dot(r_ref[p], w_ref[p],
                             preferred_element_type=jnp.float32)

    unroll = True if tpl <= 16 else 4
    acc_ref[...] = lax.fori_loop(0, tpl, body, acc_ref[...], unroll=unroll)

    @pl.when(k == pl.num_programs(1) - 1)
    def _():
        z = acc_ref[...] + b_ref[...]
        if output_fun == "sigmoid":
            z = jax.nn.sigmoid(z)
        elif output_fun == "tanh":
            z = jnp.tanh(z)
        o_ref[...] = z.astype(o_ref.dtype)


def linear_out_pallas(r_tm, w_lin, b_lin, output_fun="sigmoid"):
    """r_tm: (P, B, Hp) bf16 time-major; w_lin: (P, Hp, Mp) bf16; b_lin:
    (1, Mp) f32 -> (B, Mp) f32. Consumes r directly time-major (K tiled over
    the window P) — no XLA transpose/reshape of the activation."""
    P, B, Hp = r_tm.shape
    Mp = w_lin.shape[-1]
    btl = _pick_batch_tile(B)
    tpl = _pick_chunk(P, (32, 16, 8))
    kernel = functools.partial(_linear_out_kernel, output_fun=output_fun)
    return pl.pallas_call(
        kernel,
        out_shape=jax.ShapeDtypeStruct((B, Mp), jnp.float32),
        grid_spec=pltpu.PrefetchScalarGridSpec(
            num_scalar_prefetch=0,
            grid=(B // btl, P // tpl),            # K reduction axis last
            in_specs=[
                pl.BlockSpec((tpl, btl, Hp), lambda b, k: (k, b, 0)),
                pl.BlockSpec((tpl, Hp, Mp), lambda b, k: (k, 0, 0)),
                pl.BlockSpec((1, Mp), lambda b, k: (0, 0)),
            ],
            out_specs=pl.BlockSpec((btl, Mp), lambda b, k: (b, 0)),
            scratch_shapes=[pltpu.VMEM((btl, Mp), jnp.float32)],
        ),
        compiler_params=pltpu.CompilerParams(
            dimension_semantics=("parallel", "arbitrary"),
            vmem_limit_bytes=_vmem_limit_bytes()),
    )(r_tm, w_lin, b_lin)


# ------------------------------------ Model ------------------------------------

def lstm_model_forward(x, params, output_fun="sigmoid"):
    """Full LSTM-module forward: (B, P, m) f32 -> (B, m) f32 (inference)."""
    B, P, m = x.shape
    Hp = params["w_hh"].shape[0]
    # One small time-major transpose of the raw input; all larger tensors
    # (gates, r_out) are produced and consumed time-major by the kernels.
    x_tm = jnp.swapaxes(x, 0, 1).astype(jnp.bfloat16)              # (P, B, m)
    gates_tm = input_proj_pallas(
        x_tm.reshape(P * B, m), params["w_ih"], params["b_lstm"]
    ).reshape(P, B, 4 * Hp)                                        # free reshape
    r_tm = lstm_recurrence_pallas(gates_tm, params["w_hh"])        # (P, B, Hp)
    # nn.Dropout(p=args.dropout) is identity at inference time.
    out_pad = linear_out_pallas(r_tm, params["w_lin"], params["b_lin"],
                                output_fun)                        # (B, Mp)
    return out_pad[:, :m]


def init_params(key, P, m, H):
    """LSTM + Linear parameters, gate-packed (i, f, o, g), zero-padded so H
    and m become lane-aligned (multiples of 128), stored bf16 (biases f32).

    To import real nn.LSTM weights: permute PyTorch's (i, f, g, o) gate rows
    to (i, f, o, g), transpose to (in, 4H), then zero-pad into this layout."""
    Hp = _round_up(H, _LANE)
    Mp = _round_up(m, _LANE)
    k1, k2, k3, k4, k5, k6 = jax.random.split(key, 6)
    s = 1.0 / jnp.sqrt(H)
    w_ih = jax.random.uniform(k1, (m, 4, H), jnp.float32, -s, s)
    w_hh = jax.random.uniform(k2, (H, 4, H), jnp.float32, -s, s)
    b_ih = jax.random.uniform(k3, (4, H), jnp.float32, -s, s)
    b_hh = jax.random.uniform(k4, (4, H), jnp.float32, -s, s)
    ls = 1.0 / jnp.sqrt(P * H)
    w_lin = jax.random.uniform(k5, (P, H, m), jnp.float32, -ls, ls)
    b_lin = jax.random.uniform(k6, (1, m), jnp.float32, -ls, ls)

    w_ih_p = jnp.zeros((m, 4, Hp), jnp.float32).at[:, :, :H].set(w_ih)
    w_hh_p = jnp.zeros((Hp, 4, Hp), jnp.float32).at[:H, :, :H].set(w_hh)
    b_p = jnp.zeros((1, 4, Hp), jnp.float32).at[0, :, :H].set(b_ih + b_hh)
    w_lin_p = jnp.zeros((P, Hp, Mp), jnp.float32).at[:, :H, :m].set(w_lin)
    b_lin_p = jnp.zeros((1, Mp), jnp.float32).at[:, :m].set(b_lin)

    return {
        "w_ih": w_ih_p.reshape(m, 4 * Hp).astype(jnp.bfloat16),
        "w_hh": w_hh_p.reshape(Hp, 4 * Hp).astype(jnp.bfloat16),
        "b_lstm": b_p.reshape(1, 4 * Hp),          # f32, biases appear summed
        "w_lin": w_lin_p.astype(jnp.bfloat16),
        "b_lin": b_lin_p,                          # f32
    }


# ------------------------------ pure-JAX reference -----------------------------

def lstm_model_reference(x, params, output_fun="sigmoid"):
    """f32 reference on the same (bf16-rounded, padded) parameters."""
    B, P, m = x.shape
    Hp = params["w_hh"].shape[0]
    w_ih = params["w_ih"].astype(jnp.float32)
    w_hh = params["w_hh"].astype(jnp.float32)
    b = params["b_lstm"][0].astype(jnp.float32)
    w_lin = params["w_lin"].astype(jnp.float32)
    b_lin = params["b_lin"].astype(jnp.float32)

    x_tm = jnp.swapaxes(x, 0, 1).astype(jnp.bfloat16).astype(jnp.float32)

    def step(carry, x_t):
        h, c = carry
        gates = x_t @ w_ih + h @ w_hh + b
        i = jax.nn.sigmoid(gates[:, 0 * Hp:1 * Hp])
        f = jax.nn.sigmoid(gates[:, 1 * Hp:2 * Hp])
        o = jax.nn.sigmoid(gates[:, 2 * Hp:3 * Hp])
        g = jnp.tanh(gates[:, 3 * Hp:])
        c = f * c + i * g
        h = o * jnp.tanh(c)
        return (h, c), h

    h0 = jnp.zeros((B, Hp), jnp.float32)
    c0 = jnp.zeros((B, Hp), jnp.float32)
    (_, _), hs = lax.scan(step, (h0, c0), x_tm)          # (P, B, Hp)
    z = jnp.einsum("pbh,phm->bm", hs, w_lin) + b_lin
    if output_fun == "sigmoid":
        z = jax.nn.sigmoid(z)
    elif output_fun == "tanh":
        z = jnp.tanh(z)
    return z[:, :m]


# -------------------------------------- main -----------------------------------

if __name__ == "__main__":
    B, P, m, H = 8, 8, 16, 32   # batch, args.window, data.m, args.hidRNN

    key = jax.random.PRNGKey(0)
    kx, kp = jax.random.split(key)
    x = jax.random.normal(kx, (B, P, m), jnp.float32)
    params = init_params(kp, P, m, H)

    fwd = jax.jit(lstm_model_forward)
    out = jax.block_until_ready(fwd(x, params))

    ref = lstm_model_reference(x, params)
    assert out.shape == (B, m)
    err = float(jnp.max(jnp.abs(out - ref)))
    assert jnp.allclose(out, ref, atol=2e-2, rtol=2e-2), (
        f"mismatch vs reference (bf16 storage), max abs err {err}")
    print("KERNEL_OK")
</pallas_src>

<mosaic_0001>
module attributes {stable_mosaic.version = 11 : i64} {
  func.func @_input_proj_kernel(%arg0: i32, %arg1: memref<64x16xbf16, #tpu.memory_space<vmem>>, %arg2: memref<16x512xbf16, #tpu.memory_space<vmem>>, %arg3: memref<1x512xf32, #tpu.memory_space<vmem>>, %arg4: memref<64x512xbf16, #tpu.memory_space<vmem>>) attributes {dimension_semantics = [#tpu.dimension_semantics<parallel>], iteration_bounds = array<i64: 1>, scalar_prefetch = 0 : i64, scratch_operands = 0 : i64, tpu.core_type = #tpu.core_type<tc>, window_params = [{transform_indices = @transform_0, window_bounds = array<i64: 64, 16>}, {pipeline_mode = #tpu.pipeline_mode<synchronous>, transform_indices = @transform_1, window_bounds = array<i64: 16, 512>}, {pipeline_mode = #tpu.pipeline_mode<synchronous>, transform_indices = @transform_2, window_bounds = array<i64: 1, 512>}, {transform_indices = @transform_3, window_bounds = array<i64: 64, 512>}]} {
    %c0 = arith.constant 0 : index
    %c0_0 = arith.constant 0 : index
    %0 = vector.load %arg1[%c0, %c0_0] : memref<64x16xbf16, #tpu.memory_space<vmem>>, vector<64x16xbf16>
    %c0_1 = arith.constant 0 : index
    %c0_2 = arith.constant 0 : index
    %1 = vector.load %arg2[%c0_1, %c0_2] : memref<16x512xbf16, #tpu.memory_space<vmem>>, vector<16x512xbf16>
    %cst = arith.constant dense<0.000000e+00> : vector<64x512xf32>
    %2 = tpu.matmul %0, %1, %cst {dimension_numbers = #tpu.dot_dimension_numbers<[1], [0], [0], [1], [0, 0, 1, 1], [], []>} : vector<64x16xbf16>, vector<16x512xbf16>, vector<64x512xf32> -> vector<64x512xf32>
    %c0_3 = arith.constant 0 : index
    %c0_4 = arith.constant 0 : index
    %3 = vector.load %arg3[%c0_3, %c0_4] : memref<1x512xf32, #tpu.memory_space<vmem>>, vector<1x512xf32>
    %4 = vector.broadcast %3 : vector<1x512xf32> to vector<64x512xf32>
    %5 = arith.addf %2, %4 : vector<64x512xf32>
    %6 = arith.truncf %5 : vector<64x512xf32> to vector<64x512xbf16>
    %c0_5 = arith.constant 0 : index
    %c0_6 = arith.constant 0 : index
    %7 = vector.load %arg4[%c0_5, %c0_6] : memref<64x512xbf16, #tpu.memory_space<vmem>>, vector<64x512xbf16>
    tpu.vector_store %arg4[%c0_5, %c0_6], %6 {strides = array<i32>} : memref<64x512xbf16, #tpu.memory_space<vmem>>, vector<64x512xbf16>,
    return
  }
  func.func @transform_0(%arg0: i32) -> (i32, i32) {
    %c0_i32 = arith.constant 0 : i32
    %c0_i32_0 = arith.constant 0 : i32
    return %arg0, %c0_i32 : i32, i32
  }
  func.func @transform_1(%arg0: i32) -> (i32, i32) {
    %c0_i32 = arith.constant 0 : i32
    %c0_i32_0 = arith.constant 0 : i32
    %c0_i32_1 = arith.constant 0 : i32
    return %c0_i32, %c0_i32_0 : i32, i32
  }
  func.func @transform_2(%arg0: i32) -> (i32, i32) {
    %c0_i32 = arith.constant 0 : i32
    %c0_i32_0 = arith.constant 0 : i32
    %c0_i32_1 = arith.constant 0 : i32
    return %c0_i32, %c0_i32_0 : i32, i32
  }
  func.func @transform_3(%arg0: i32) -> (i32, i32) {
    %c0_i32 = arith.constant 0 : i32
    %c0_i32_0 = arith.constant 0 : i32
    return %arg0, %c0_i32 : i32, i32
  }
}

module attributes {stable_mosaic.version = 11 : i64} {
  func.func @_lstm_recurrence_kernel(%arg0: i32, %arg1: i32, %arg2: memref<8x8x512xbf16, #tpu.memory_space<vmem>>, %arg3: memref<128x512xbf16, #tpu.memory_space<vmem>>, %arg4: memref<8x8x128xbf16, #tpu.memory_space<vmem>>, %arg5: memref<8x128xf32, #tpu.memory_space<vmem>>, %arg6: memref<8x128xf32, #tpu.memory_space<vmem>>) attributes {dimension_semantics = [#tpu.dimension_semantics<parallel>, #tpu.dimension_semantics<arbitrary>], iteration_bounds = array<i64: 1, 1>, scalar_prefetch = 0 : i64, scratch_operands = 2 : i64, tpu.core_type = #tpu.core_type<tc>, window_params = [{transform_indices = @transform_0, window_bounds = array<i64: 8, 8, 512>}, {pipeline_mode = #tpu.pipeline_mode<synchronous>, transform_indices = @transform_1, window_bounds = array<i64: 128, 512>}, {transform_indices = @transform_2, window_bounds = array<i64: 8, 8, 128>}]} {
    %c0_i32 = arith.constant 0 : i32
    %0 = arith.cmpi eq, %arg1, %c0_i32 : i32
    %1 = arith.extui %0 : i1 to i32
    %c0_i32_0 = arith.constant 0 : i32
    %2 = arith.cmpi ne, %1, %c0_i32_0 : i32
    scf.if %2 {
      %cst_74 = arith.constant 0.000000e+00 : f32
      %248 = vector.broadcast %cst_74 : f32 to vector<8x128xf32>
      %c0_75 = arith.constant 0 : index
      %c0_76 = arith.constant 0 : index
      %249 = vector.load %arg5[%c0_75, %c0_76] : memref<8x128xf32, #tpu.memory_space<vmem>>, vector<8x128xf32>
      tpu.vector_store %arg5[%c0_75, %c0_76], %248 {strides = array<i32>} : memref<8x128xf32, #tpu.memory_space<vmem>>, vector<8x128xf32>,
      %cst_77 = arith.constant 0.000000e+00 : f32
      %250 = vector.broadcast %cst_77 : f32 to vector<8x128xf32>
      %c0_78 = arith.constant 0 : index
      %c0_79 = arith.constant 0 : index
      %251 = vector.load %arg6[%c0_78, %c0_79] : memref<8x128xf32, #tpu.memory_space<vmem>>, vector<8x128xf32>
      tpu.vector_store %arg6[%c0_78, %c0_79], %250 {strides = array<i32>} : memref<8x128xf32, #tpu.memory_space<vmem>>, vector<8x128xf32>,
    } else {
    }
    %c0 = arith.constant 0 : index
    %c0_1 = arith.constant 0 : index
    %3 = vector.load %arg3[%c0, %c0_1] : memref<128x512xbf16, #tpu.memory_space<vmem>>, vector<128x512xbf16>
    %c0_2 = arith.constant 0 : index
    %c0_3 = arith.constant 0 : index
    %4 = vector.load %arg5[%c0_2, %c0_3] : memref<8x128xf32, #tpu.memory_space<vmem>>, vector<8x128xf32>
    %c0_4 = arith.constant 0 : index
    %c0_5 = arith.constant 0 : index
    %5 = vector.load %arg6[%c0_4, %c0_5] : memref<8x128xf32, #tpu.memory_space<vmem>>, vector<8x128xf32>
    %c0_i32_6 = arith.constant 0 : i32
    %6 = arith.index_cast %c0_i32_6 : i32 to index
    %c0_7 = arith.constant 0 : index
    %c0_8 = arith.constant 0 : index
    %7 = vector.load %arg2[%6, %c0_7, %c0_8] : memref<8x8x512xbf16, #tpu.memory_space<vmem>>, vector<1x8x512xbf16>
    %8 = vector.shape_cast %7 : vector<1x8x512xbf16> to vector<8x512xbf16>
    %9 = arith.extf %8 : vector<8x512xbf16> to vector<8x512xf32>
    %10 = arith.truncf %4 : vector<8x128xf32> to vector<8x128xbf16>
    %cst = arith.constant dense<0.000000e+00> : vector<8x512xf32>
    %11 = tpu.matmul %10, %3, %cst {dimension_numbers = #tpu.dot_dimension_numbers<[1], [0], [0], [1], [0, 0, 1, 1], [], []>} : vector<8x128xbf16>, vector<128x512xbf16>, vector<8x512xf32> -> vector<8x512xf32>
    %12 = arith.addf %9, %11 : vector<8x512xf32>
    %13 = vector.extract_strided_slice %12 {offsets = [0, 0], sizes = [8, 384], strides = [1, 1]} : vector<8x512xf32> to vector<8x384xf32>
    %cst_9 = arith.constant 5.000000e-01 : f32
    %14 = vector.broadcast %cst_9 : f32 to vector<8x384xf32>
    %15 = arith.mulf %14, %13 : vector<8x384xf32>
    %16 = math.tanh %15 : vector<8x384xf32>
    %cst_10 = arith.constant 1.000000e+00 : f32
    %17 = vector.broadcast %cst_10 : f32 to vector<8x384xf32>
    %18 = arith.addf %16, %17 : vector<8x384xf32>
    %cst_11 = arith.constant 5.000000e-01 : f32
    %19 = vector.broadcast %cst_11 : f32 to vector<8x384xf32>
    %20 = arith.mulf %19, %18 : vector<8x384xf32>
    %21 = vector.extract_strided_slice %20 {offsets = [0, 0], sizes = [8, 128], strides = [1, 1]} : vector<8x384xf32> to vector<8x128xf32>
    %22 = vector.extract_strided_slice %20 {offsets = [0, 128], sizes = [8, 128], strides = [1, 1]} : vector<8x384xf32> to vector<8x128xf32>
    %23 = vector.extract_strided_slice %20 {offsets = [0, 256], sizes = [8, 128], strides = [1, 1]} : vector<8x384xf32> to vector<8x128xf32>
    %24 = vector.extract_strided_slice %12 {offsets = [0, 384], sizes = [8, 128], strides = [1, 1]} : vector<8x512xf32> to vector<8x128xf32>
    %25 = math.tanh %24 : vector<8x128xf32>
    %26 = arith.mulf %22, %5 : vector<8x128xf32>
    %27 = arith.mulf %21, %25 : vector<8x128xf32>
    %28 = arith.addf %26, %27 : vector<8x128xf32>
    %29 = math.tanh %28 : vector<8x128xf32>
    %30 = arith.mulf %23, %29 : vector<8x128xf32>
    %31 = arith.truncf %30 : vector<8x128xf32> to vector<8x128xbf16>
    %32 = arith.index_cast %c0_i32_6 : i32 to index
    %c0_12 = arith.constant 0 : index
    %c0_13 = arith.constant 0 : index
    %33 = vector.load %arg4[%32, %c0_12, %c0_13] : memref<8x8x128xbf16, #tpu.memory_space<vmem>>, vector<1x8x128xbf16>
    %34 = vector.shape_cast %33 : vector<1x8x128xbf16> to vector<8x128xbf16>
    %35 = vector.shape_cast %31 : vector<8x128xbf16> to vector<1x8x128xbf16>
    tpu.vector_store %arg4[%32, %c0_12, %c0_13], %35 {strides = array<i32>} : memref<8x8x128xbf16, #tpu.memory_space<vmem>>, vector<1x8x128xbf16>,
    %c1_i32 = arith.constant 1 : i32
    %36 = arith.index_cast %c1_i32 : i32 to index
    %c0_14 = arith.constant 0 : index
    %c0_15 = arith.constant 0 : index
    %37 = vector.load %arg2[%36, %c0_14, %c0_15] : memref<8x8x512xbf16, #tpu.memory_space<vmem>>, vector<1x8x512xbf16>
    %38 = vector.shape_cast %37 : vector<1x8x512xbf16> to vector<8x512xbf16>
    %39 = arith.extf %38 : vector<8x512xbf16> to vector<8x512xf32>
    %40 = arith.truncf %30 : vector<8x128xf32> to vector<8x128xbf16>
    %cst_16 = arith.constant dense<0.000000e+00> : vector<8x512xf32>
    %41 = tpu.matmul %40, %3, %cst_16 {dimension_numbers = #tpu.dot_dimension_numbers<[1], [0], [0], [1], [0, 0, 1, 1], [], []>} : vector<8x128xbf16>, vector<128x512xbf16>, vector<8x512xf32> -> vector<8x512xf32>
    %42 = arith.addf %39, %41 : vector<8x512xf32>
    %43 = vector.extract_strided_slice %42 {offsets = [0, 0], sizes = [8, 384], strides = [1, 1]} : vector<8x512xf32> to vector<8x384xf32>
    %cst_17 = arith.constant 5.000000e-01 : f32
    %44 = vector.broadcast %cst_17 : f32 to vector<8x384xf32>
    %45 = arith.mulf %44, %43 : vector<8x384xf32>
    %46 = math.tanh %45 : vector<8x384xf32>
    %cst_18 = arith.constant 1.000000e+00 : f32
    %47 = vector.broadcast %cst_18 : f32 to vector<8x384xf32>
    %48 = arith.addf %46, %47 : vector<8x384xf32>
    %cst_19 = arith.constant 5.000000e-01 : f32
    %49 = vector.broadcast %cst_19 : f32 to vector<8x384xf32>
    %50 = arith.mulf %49, %48 : vector<8x384xf32>
    %51 = vector.extract_strided_slice %50 {offsets = [0, 0], sizes = [8, 128], strides = [1, 1]} : vector<8x384xf32> to vector<8x128xf32>
    %52 = vector.extract_strided_slice %50 {offsets = [0, 128], sizes = [8, 128], strides = [1, 1]} : vector<8x384xf32> to vector<8x128xf32>
    %53 = vector.extract_strided_slice %50 {offsets = [0, 256], sizes = [8, 128], strides = [1, 1]} : vector<8x384xf32> to vector<8x128xf32>
    %54 = vector.extract_strided_slice %42 {offsets = [0, 384], sizes = [8, 128], strides = [1, 1]} : vector<8x512xf32> to vector<8x128xf32>
    %55 = math.tanh %54 : vector<8x128xf32>
    %56 = arith.mulf %52, %28 : vector<8x128xf32>
    %57 = arith.mulf %51, %55 : vector<8x128xf32>
    %58 = arith.addf %56, %57 : vector<8x128xf32>
    %59 = math.tanh %58 : vector<8x128xf32>
    %60 = arith.mulf %53, %59 : vector<8x128xf32>
    %61 = arith.truncf %60 : vector<8x128xf32> to vector<8x128xbf16>
    %62 = arith.index_cast %c1_i32 : i32 to index
    %c0_20 = arith.constant 0 : index
    %c0_21 = arith.constant 0 : index
    %63 = vector.load %arg4[%62, %c0_20, %c0_21] : memref<8x8x128xbf16, #tpu.memory_space<vmem>>, vector<1x8x128xbf16>
    %64 = vector.shape_cast %63 : vector<1x8x128xbf16> to vector<8x128xbf16>
    %65 = vector.shape_cast %61 : vector<8x128xbf16> to vector<1x8x128xbf16>
    tpu.vector_store %arg4[%62, %c0_20, %c0_21], %65 {strides = array<i32>} : memref<8x8x128xbf16, #tpu.memory_space<vmem>>, vector<1x8x128xbf16>,
    %c2_i32 = arith.constant 2 : i32
    %66 = arith.index_cast %c2_i32 : i32 to index
    %c0_22 = arith.constant 0 : index
    %c0_23 = arith.constant 0 : index
    %67 = vector.load %arg2[%66, %c0_22, %c0_23] : memref<8x8x512xbf16, #tpu.memory_space<vmem>>, vector<1x8x512xbf16>
    %68 = vector.shape_cast %67 : vector<1x8x512xbf16> to vector<8x512xbf16>
    %69 = arith.extf %68 : vector<8x512xbf16> to vector<8x512xf32>
    %70 = arith.truncf %60 : vector<8x128xf32> to vector<8x128xbf16>
    %cst_24 = arith.constant dense<0.000000e+00> : vector<8x512xf32>
    %71 = tpu.matmul %70, %3, %cst_24 {dimension_numbers = #tpu.dot_dimension_numbers<[1], [0], [0], [1], [0, 0, 1, 1], [], []>} : vector<8x128xbf16>, vector<128x512xbf16>, vector<8x512xf32> -> vector<8x512xf32>
    %72 = arith.addf %69, %71 : vector<8x512xf32>
    %73 = vector.extract_strided_slice %72 {offsets = [0, 0], sizes = [8, 384], strides = [1, 1]} : vector<8x512xf32> to vector<8x384xf32>
    %cst_25 = arith.constant 5.000000e-01 : f32
    %74 = vector.broadcast %cst_25 : f32 to vector<8x384xf32>
    %75 = arith.mulf %74, %73 : vector<8x384xf32>
    %76 = math.tanh %75 : vector<8x384xf32>
    %cst_26 = arith.constant 1.000000e+00 : f32
    %77 = vector.broadcast %cst_26 : f32 to vector<8x384xf32>
    %78 = arith.addf %76, %77 : vector<8x384xf32>
    %cst_27 = arith.constant 5.000000e-01 : f32
    %79 = vector.broadcast %cst_27 : f32 to vector<8x384xf32>
    %80 = arith.mulf %79, %78 : vector<8x384xf32>
    %81 = vector.extract_strided_slice %80 {offsets = [0, 0], sizes = [8, 128], strides = [1, 1]} : vector<8x384xf32> to vector<8x128xf32>
    %82 = vector.extract_strided_slice %80 {offsets = [0, 128], sizes = [8, 128], strides = [1, 1]} : vector<8x384xf32> to vector<8x128xf32>
    %83 = vector.extract_strided_slice %80 {offsets = [0, 256], sizes = [8, 128], strides = [1, 1]} : vector<8x384xf32> to vector<8x128xf32>
    %84 = vector.extract_strided_slice %72 {offsets = [0, 384], sizes = [8, 128], strides = [1, 1]} : vector<8x512xf32> to vector<8x128xf32>
    %85 = math.tanh %84 : vector<8x128xf32>
    %86 = arith.mulf %82, %58 : vector<8x128xf32>
    %87 = arith.mulf %81, %85 : vector<8x128xf32>
    %88 = arith.addf %86, %87 : vector<8x128xf32>
    %89 = math.tanh %88 : vector<8x128xf32>
    %90 = arith.mulf %83, %89 : vector<8x128xf32>
    %91 = arith.truncf %90 : vector<8x128xf32> to vector<8x128xbf16>
    %92 = arith.index_cast %c2_i32 : i32 to index
    %c0_28 = arith.constant 0 : index
    %c0_29 = arith.constant 0 : index
    %93 = vector.load %arg4[%92, %c0_28, %c0_29] : memref<8x8x128xbf16, #tpu.memory_space<vmem>>, vector<1x8x128xbf16>
    %94 = vector.shape_cast %93 : vector<1x8x128xbf16> to vector<8x128xbf16>
    %95 = vector.shape_cast %91 : vector<8x128xbf16> to vector<1x8x128xbf16>
    tpu.vector_store %arg4[%92, %c0_28, %c0_29], %95 {strides = array<i32>} : memref<8x8x128xbf16, #tpu.memory_space<vmem>>, vector<1x8x128xbf16>,
    %c3_i32 = arith.constant 3 : i32
    %96 = arith.index_cast %c3_i32 : i32 to index
    %c0_30 = arith.constant 0 : index
    %c0_31 = arith.constant 0 : index
    %97 = vector.load %arg2[%96, %c0_30, %c0_31] : memref<8x8x512xbf16, #tpu.memory_space<vmem>>, vector<1x8x512xbf16>
    %98 = vector.shape_cast %97 : vector<1x8x512xbf16> to vector<8x512xbf16>
    %99 = arith.extf %98 : vector<8x512xbf16> to vector<8x512xf32>
    %100 = arith.truncf %90 : vector<8x128xf32> to vector<8x128xbf16>
    %cst_32 = arith.constant dense<0.000000e+00> : vector<8x512xf32>
    %101 = tpu.matmul %100, %3, %cst_32 {dimension_numbers = #tpu.dot_dimension_numbers<[1], [0], [0], [1], [0, 0, 1, 1], [], []>} : vector<8x128xbf16>, vector<128x512xbf16>, vector<8x512xf32> -> vector<8x512xf32>
    %102 = arith.addf %99, %101 : vector<8x512xf32>
    %103 = vector.extract_strided_slice %102 {offsets = [0, 0], sizes = [8, 384], strides = [1, 1]} : vector<8x512xf32> to vector<8x384xf32>
    %cst_33 = arith.constant 5.000000e-01 : f32
    %104 = vector.broadcast %cst_33 : f32 to vector<8x384xf32>
    %105 = arith.mulf %104, %103 : vector<8x384xf32>
    %106 = math.tanh %105 : vector<8x384xf32>
    %cst_34 = arith.constant 1.000000e+00 : f32
    %107 = vector.broadcast %cst_34 : f32 to vector<8x384xf32>
    %108 = arith.addf %106, %107 : vector<8x384xf32>
    %cst_35 = arith.constant 5.000000e-01 : f32
    %109 = vector.broadcast %cst_35 : f32 to vector<8x384xf32>
    %110 = arith.mulf %109, %108 : vector<8x384xf32>
    %111 = vector.extract_strided_slice %110 {offsets = [0, 0], sizes = [8, 128], strides = [1, 1]} : vector<8x384xf32> to vector<8x128xf32>
    %112 = vector.extract_strided_slice %110 {offsets = [0, 128], sizes = [8, 128], strides = [1, 1]} : vector<8x384xf32> to vector<8x128xf32>
    %113 = vector.extract_strided_slice %110 {offsets = [0, 256], sizes = [8, 128], strides = [1, 1]} : vector<8x384xf32> to vector<8x128xf32>
    %114 = vector.extract_strided_slice %102 {offsets = [0, 384], sizes = [8, 128], strides = [1, 1]} : vector<8x512xf32> to vector<8x128xf32>
    %115 = math.tanh %114 : vector<8x128xf32>
    %116 = arith.mulf %112, %88 : vector<8x128xf32>
    %117 = arith.mulf %111, %115 : vector<8x128xf32>
    %118 = arith.addf %116, %117 : vector<8x128xf32>
    %119 = math.tanh %118 : vector<8x128xf32>
    %120 = arith.mulf %113, %119 : vector<8x128xf32>
    %121 = arith.truncf %120 : vector<8x128xf32> to vector<8x128xbf16>
    %122 = arith.index_cast %c3_i32 : i32 to index
    %c0_36 = arith.constant 0 : index
    %c0_37 = arith.constant 0 : index
    %123 = vector.load %arg4[%122, %c0_36, %c0_37] : memref<8x8x128xbf16, #tpu.memory_space<vmem>>, vector<1x8x128xbf16>
    %124 = vector.shape_cast %123 : vector<1x8x128xbf16> to vector<8x128xbf16>
    %125 = vector.shape_cast %121 : vector<8x128xbf16> to vector<1x8x128xbf16>
    tpu.vector_store %arg4[%122, %c0_36, %c0_37], %125 {strides = array<i32>} : memref<8x8x128xbf16, #tpu.memory_space<vmem>>, vector<1x8x128xbf16>,
    %c4_i32 = arith.constant 4 : i32
    %126 = arith.index_cast %c4_i32 : i32 to index
    %c0_38 = arith.constant 0 : index
    %c0_39 = arith.constant 0 : index
    %127 = vector.load %arg2[%126, %c0_38, %c0_39] : memref<8x8x512xbf16, #tpu.memory_space<vmem>>, vector<1x8x512xbf16>
    %128 = vector.shape_cast %127 : vector<1x8x512xbf16> to vector<8x512xbf16>
    %129 = arith.extf %128 : vector<8x512xbf16> to vector<8x512xf32>
    %130 = arith.truncf %120 : vector<8x128xf32> to vector<8x128xbf16>
    %cst_40 = arith.constant dense<0.000000e+00> : vector<8x512xf32>
    %131 = tpu.matmul %130, %3, %cst_40 {dimension_numbers = #tpu.dot_dimension_numbers<[1], [0], [0], [1], [0, 0, 1, 1], [], []>} : vector<8x128xbf16>, vector<128x512xbf16>, vector<8x512xf32> -> vector<8x512xf32>
    %132 = arith.addf %129, %131 : vector<8x512xf32>
    %133 = vector.extract_strided_slice %132 {offsets = [0, 0], sizes = [8, 384], strides = [1, 1]} : vector<8x512xf32> to vector<8x384xf32>
    %cst_41 = arith.constant 5.000000e-01 : f32
    %134 = vector.broadcast %cst_41 : f32 to vector<8x384xf32>
    %135 = arith.mulf %134, %133 : vector<8x384xf32>
    %136 = math.tanh %135 : vector<8x384xf32>
    %cst_42 = arith.constant 1.000000e+00 : f32
    %137 = vector.broadcast %cst_42 : f32 to vector<8x384xf32>
    %138 = arith.addf %136, %137 : vector<8x384xf32>
    %cst_43 = arith.constant 5.000000e-01 : f32
    %139 = vector.broadcast %cst_43 : f32 to vector<8x384xf32>
    %140 = arith.mulf %139, %138 : vector<8x384xf32>
    %141 = vector.extract_strided_slice %140 {offsets = [0, 0], sizes = [8, 128], strides = [1, 1]} : vector<8x384xf32> to vector<8x128xf32>
    %142 = vector.extract_strided_slice %140 {offsets = [0, 128], sizes = [8, 128], strides = [1, 1]} : vector<8x384xf32> to vector<8x128xf32>
    %143 = vector.extract_strided_slice %140 {offsets = [0, 256], sizes = [8, 128], strides = [1, 1]} : vector<8x384xf32> to vector<8x128xf32>
    %144 = vector.extract_strided_slice %132 {offsets = [0, 384], sizes = [8, 128], strides = [1, 1]} : vector<8x512xf32> to vector<8x128xf32>
    %145 = math.tanh %144 : vector<8x128xf32>
    %146 = arith.mulf %142, %118 : vector<8x128xf32>
    %147 = arith.mulf %141, %145 : vector<8x128xf32>
    %148 = arith.addf %146, %147 : vector<8x128xf32>
    %149 = math.tanh %148 : vector<8x128xf32>
    %150 = arith.mulf %143, %149 : vector<8x128xf32>
    %151 = arith.truncf %150 : vector<8x128xf32> to vector<8x128xbf16>
    %152 = arith.index_cast %c4_i32 : i32 to index
    %c0_44 = arith.constant 0 : index
    %c0_45 = arith.constant 0 : index
    %153 = vector.load %arg4[%152, %c0_44, %c0_45] : memref<8x8x128xbf16, #tpu.memory_space<vmem>>, vector<1x8x128xbf16>
    %154 = vector.shape_cast %153 : vector<1x8x128xbf16> to vector<8x128xbf16>
    %155 = vector.shape_cast %151 : vector<8x128xbf16> to vector<1x8x128xbf16>
    tpu.vector_store %arg4[%152, %c0_44, %c0_45], %155 {strides = array<i32>} : memref<8x8x128xbf16, #tpu.memory_space<vmem>>, vector<1x8x128xbf16>,
    %c5_i32 = arith.constant 5 : i32
    %156 = arith.index_cast %c5_i32 : i32 to index
    %c0_46 = arith.constant 0 : index
    %c0_47 = arith.constant 0 : index
    %157 = vector.load %arg2[%156, %c0_46, %c0_47] : memref<8x8x512xbf16, #tpu.memory_space<vmem>>, vector<1x8x512xbf16>
    %158 = vector.shape_cast %157 : vector<1x8x512xbf16> to vector<8x512xbf16>
    %159 = arith.extf %158 : vector<8x512xbf16> to vector<8x512xf32>
    %160 = arith.truncf %150 : vector<8x128xf32> to vector<8x128xbf16>
    %cst_48 = arith.constant dense<0.000000e+00> : vector<8x512xf32>
    %161 = tpu.matmul %160, %3, %cst_48 {dimension_numbers = #tpu.dot_dimension_numbers<[1], [0], [0], [1], [0, 0, 1, 1], [], []>} : vector<8x128xbf16>, vector<128x512xbf16>, vector<8x512xf32> -> vector<8x512xf32>
    %162 = arith.addf %159, %161 : vector<8x512xf32>
    %163 = vector.extract_strided_slice %162 {offsets = [0, 0], sizes = [8, 384], strides = [1, 1]} : vector<8x512xf32> to vector<8x384xf32>
    %cst_49 = arith.constant 5.000000e-01 : f32
    %164 = vector.broadcast %cst_49 : f32 to vector<8x384xf32>
    %165 = arith.mulf %164, %163 : vector<8x384xf32>
    %166 = math.tanh %165 : vector<8x384xf32>
    %cst_50 = arith.constant 1.000000e+00 : f32
    %167 = vector.broadcast %cst_50 : f32 to vector<8x384xf32>
    %168 = arith.addf %166, %167 : vector<8x384xf32>
    %cst_51 = arith.constant 5.000000e-01 : f32
    %169 = vector.broadcast %cst_51 : f32 to vector<8x384xf32>
    %170 = arith.mulf %169, %168 : vector<8x384xf32>
    %171 = vector.extract_strided_slice %170 {offsets = [0, 0], sizes = [8, 128], strides = [1, 1]} : vector<8x384xf32> to vector<8x128xf32>
    %172 = vector.extract_strided_slice %170 {offsets = [0, 128], sizes = [8, 128], strides = [1, 1]} : vector<8x384xf32> to vector<8x128xf32>
    %173 = vector.extract_strided_slice %170 {offsets = [0, 256], sizes = [8, 128], strides = [1, 1]} : vector<8x384xf32> to vector<8x128xf32>
    %174 = vector.extract_strided_slice %162 {offsets = [0, 384], sizes = [8, 128], strides = [1, 1]} : vector<8x512xf32> to vector<8x128xf32>
    %175 = math.tanh %174 : vector<8x128xf32>
    %176 = arith.mulf %172, %148 : vector<8x128xf32>
    %177 = arith.mulf %171, %175 : vector<8x128xf32>
    %178 = arith.addf %176, %177 : vector<8x128xf32>
    %179 = math.tanh %178 : vector<8x128xf32>
    %180 = arith.mulf %173, %179 : vector<8x128xf32>
    %181 = arith.truncf %180 : vector<8x128xf32> to vector<8x128xbf16>
    %182 = arith.index_cast %c5_i32 : i32 to index
    %c0_52 = arith.constant 0 : index
    %c0_53 = arith.constant 0 : index
    %183 = vector.load %arg4[%182, %c0_52, %c0_53] : memref<8x8x128xbf16, #tpu.memory_space<vmem>>, vector<1x8x128xbf16>
    %184 = vector.shape_cast %183 : vector<1x8x128xbf16> to vector<8x128xbf16>
    %185 = vector.shape_cast %181 : vector<8x128xbf16> to vector<1x8x128xbf16>
    tpu.vector_store %arg4[%182, %c0_52, %c0_53], %185 {strides = array<i32>} : memref<8x8x128xbf16, #tpu.memory_space<vmem>>, vector<1x8x128xbf16>,
    %c6_i32 = arith.constant 6 : i32
    %186 = arith.index_cast %c6_i32 : i32 to index
    %c0_54 = arith.constant 0 : index
    %c0_55 = arith.constant 0 : index
    %187 = vector.load %arg2[%186, %c0_54, %c0_55] : memref<8x8x512xbf16, #tpu.memory_space<vmem>>, vector<1x8x512xbf16>
    %188 = vector.shape_cast %187 : vector<1x8x512xbf16> to vector<8x512xbf16>
    %189 = arith.extf %188 : vector<8x512xbf16> to vector<8x512xf32>
    %190 = arith.truncf %180 : vector<8x128xf32> to vector<8x128xbf16>
    %cst_56 = arith.constant dense<0.000000e+00> : vector<8x512xf32>
    %191 = tpu.matmul %190, %3, %cst_56 {dimension_numbers = #tpu.dot_dimension_numbers<[1], [0], [0], [1], [0, 0, 1, 1], [], []>} : vector<8x128xbf16>, vector<128x512xbf16>, vector<8x512xf32> -> vector<8x512xf32>
    %192 = arith.addf %189, %191 : vector<8x512xf32>
    %193 = vector.extract_strided_slice %192 {offsets = [0, 0], sizes = [8, 384], strides = [1, 1]} : vector<8x512xf32> to vector<8x384xf32>
    %cst_57 = arith.constant 5.000000e-01 : f32
    %194 = vector.broadcast %cst_57 : f32 to vector<8x384xf32>
    %195 = arith.mulf %194, %193 : vector<8x384xf32>
    %196 = math.tanh %195 : vector<8x384xf32>
    %cst_58 = arith.constant 1.000000e+00 : f32
    %197 = vector.broadcast %cst_58 : f32 to vector<8x384xf32>
    %198 = arith.addf %196, %197 : vector<8x384xf32>
    %cst_59 = arith.constant 5.000000e-01 : f32
    %199 = vector.broadcast %cst_59 : f32 to vector<8x384xf32>
    %200 = arith.mulf %199, %198 : vector<8x384xf32>
    %201 = vector.extract_strided_slice %200 {offsets = [0, 0], sizes = [8, 128], strides = [1, 1]} : vector<8x384xf32> to vector<8x128xf32>
    %202 = vector.extract_strided_slice %200 {offsets = [0, 128], sizes = [8, 128], strides = [1, 1]} : vector<8x384xf32> to vector<8x128xf32>
    %203 = vector.extract_strided_slice %200 {offsets = [0, 256], sizes = [8, 128], strides = [1, 1]} : vector<8x384xf32> to vector<8x128xf32>
    %204 = vector.extract_strided_slice %192 {offsets = [0, 384], sizes = [8, 128], strides = [1, 1]} : vector<8x512xf32> to vector<8x128xf32>
    %205 = math.tanh %204 : vector<8x128xf32>
    %206 = arith.mulf %202, %178 : vector<8x128xf32>
    %207 = arith.mulf %201, %205 : vector<8x128xf32>
    %208 = arith.addf %206, %207 : vector<8x128xf32>
    %209 = math.tanh %208 : vector<8x128xf32>
    %210 = arith.mulf %203, %209 : vector<8x128xf32>
    %211 = arith.truncf %210 : vector<8x128xf32> to vector<8x128xbf16>
    %212 = arith.index_cast %c6_i32 : i32 to index
    %c0_60 = arith.constant 0 : index
    %c0_61 = arith.constant 0 : index
    %213 = vector.load %arg4[%212, %c0_60, %c0_61] : memref<8x8x128xbf16, #tpu.memory_space<vmem>>, vector<1x8x128xbf16>
    %214 = vector.shape_cast %213 : vector<1x8x128xbf16> to vector<8x128xbf16>
    %215 = vector.shape_cast %211 : vector<8x128xbf16> to vector<1x8x128xbf16>
    tpu.vector_store %arg4[%212, %c0_60, %c0_61], %215 {strides = array<i32>} : memref<8x8x128xbf16, #tpu.memory_space<vmem>>, vector<1x8x128xbf16>,
    %c7_i32 = arith.constant 7 : i32
    %216 = arith.index_cast %c7_i32 : i32 to index
    %c0_62 = arith.constant 0 : index
    %c0_63 = arith.constant 0 : index
    %217 = vector.load %arg2[%216, %c0_62, %c0_63] : memref<8x8x512xbf16, #tpu.memory_space<vmem>>, vector<1x8x512xbf16>
    %218 = vector.shape_cast %217 : vector<1x8x512xbf16> to vector<8x512xbf16>
    %219 = arith.extf %218 : vector<8x512xbf16> to vector<8x512xf32>
    %220 = arith.truncf %210 : vector<8x128xf32> to vector<8x128xbf16>
    %cst_64 = arith.constant dense<0.000000e+00> : vector<8x512xf32>
    %221 = tpu.matmul %220, %3, %cst_64 {dimension_numbers = #tpu.dot_dimension_numbers<[1], [0], [0], [1], [0, 0, 1, 1], [], []>} : vector<8x128xbf16>, vector<128x512xbf16>, vector<8x512xf32> -> vector<8x512xf32>
    %222 = arith.addf %219, %221 : vector<8x512xf32>
    %223 = vector.extract_strided_slice %222 {offsets = [0, 0], sizes = [8, 384], strides = [1, 1]} : vector<8x512xf32> to vector<8x384xf32>
    %cst_65 = arith.constant 5.000000e-01 : f32
    %224 = vector.broadcast %cst_65 : f32 to vector<8x384xf32>
    %225 = arith.mulf %224, %223 : vector<8x384xf32>
    %226 = math.tanh %225 : vector<8x384xf32>
    %cst_66 = arith.constant 1.000000e+00 : f32
    %227 = vector.broadcast %cst_66 : f32 to vector<8x384xf32>
    %228 = arith.addf %226, %227 : vector<8x384xf32>
    %cst_67 = arith.constant 5.000000e-01 : f32
    %229 = vector.broadcast %cst_67 : f32 to vector<8x384xf32>
    %230 = arith.mulf %229, %228 : vector<8x384xf32>
    %231 = vector.extract_strided_slice %230 {offsets = [0, 0], sizes = [8, 128], strides = [1, 1]} : vector<8x384xf32> to vector<8x128xf32>
    %232 = vector.extract_strided_slice %230 {offsets = [0, 128], sizes = [8, 128], strides = [1, 1]} : vector<8x384xf32> to vector<8x128xf32>
    %233 = vector.extract_strided_slice %230 {offsets = [0, 256], sizes = [8, 128], strides = [1, 1]} : vector<8x384xf32> to vector<8x128xf32>
    %234 = vector.extract_strided_slice %222 {offsets = [0, 384], sizes = [8, 128], strides = [1, 1]} : vector<8x512xf32> to vector<8x128xf32>
    %235 = math.tanh %234 : vector<8x128xf32>
    %236 = arith.mulf %232, %208 : vector<8x128xf32>
    %237 = arith.mulf %231, %235 : vector<8x128xf32>
    %238 = arith.addf %236, %237 : vector<8x128xf32>
    %239 = math.tanh %238 : vector<8x128xf32>
    %240 = arith.mulf %233, %239 : vector<8x128xf32>
    %241 = arith.truncf %240 : vector<8x128xf32> to vector<8x128xbf16>
    %242 = arith.index_cast %c7_i32 : i32 to index
    %c0_68 = arith.constant 0 : index
    %c0_69 = arith.constant 0 : index
    %243 = vector.load %arg4[%242, %c0_68, %c0_69] : memref<8x8x128xbf16, #tpu.memory_space<vmem>>, vector<1x8x128xbf16>
    %244 = vector.shape_cast %243 : vector<1x8x128xbf16> to vector<8x128xbf16>
    %245 = vector.shape_cast %241 : vector<8x128xbf16> to vector<1x8x128xbf16>
    tpu.vector_store %arg4[%242, %c0_68, %c0_69], %245 {strides = array<i32>} : memref<8x8x128xbf16, #tpu.memory_space<vmem>>, vector<1x8x128xbf16>,
    %c8_i32 = arith.constant 8 : i32
    %c0_70 = arith.constant 0 : index
    %c0_71 = arith.constant 0 : index
    %246 = vector.load %arg5[%c0_70, %c0_71] : memref<8x128xf32, #tpu.memory_space<vmem>>, vector<8x128xf32>
    tpu.vector_store %arg5[%c0_70, %c0_71], %240 {strides = array<i32>} : memref<8x128xf32, #tpu.memory_space<vmem>>, vector<8x128xf32>,
    %c0_72 = arith.constant 0 : index
    %c0_73 = arith.constant 0 : index
    %247 = vector.load %arg6[%c0_72, %c0_73] : memref<8x128xf32, #tpu.memory_space<vmem>>, vector<8x128xf32>
    tpu.vector_store %arg6[%c0_72, %c0_73], %238 {strides = array<i32>} : memref<8x128xf32, #tpu.memory_space<vmem>>, vector<8x128xf32>,
    return
  }
  func.func @transform_0(%arg0: i32, %arg1: i32) -> (i32, i32, i32) {
    %c0_i32 = arith.constant 0 : i32
    %c0_i32_0 = arith.constant 0 : i32
    return %arg1, %arg0, %c0_i32 : i32, i32, i32
  }
  func.func @transform_1(%arg0: i32, %arg1: i32) -> (i32, i32) {
    %c0_i32 = arith.constant 0 : i32
    %c0_i32_0 = arith.constant 0 : i32
    %c0_i32_1 = arith.constant 0 : i32
    return %c0_i32, %c0_i32_0 : i32, i32
  }
  func.func @transform_2(%arg0: i32, %arg1: i32) -> (i32, i32, i32) {
    %c0_i32 = arith.constant 0 : i32
    %c0_i32_0 = arith.constant 0 : i32
    return %arg1, %arg0, %c0_i32 : i32, i32, i32
  }
}

module attributes {stable_mosaic.version = 11 : i64} {
  func.func @_linear_out_kernel(%arg0: i32, %arg1: i32, %arg2: memref<8x8x128xbf16, #tpu.memory_space<vmem>>, %arg3: memref<8x128x128xbf16, #tpu.memory_space<vmem>>, %arg4: memref<1x128xf32, #tpu.memory_space<vmem>>, %arg5: memref<8x128xf32, #tpu.memory_space<vmem>>, %arg6: memref<8x128xf32, #tpu.memory_space<vmem>>) attributes {dimension_semantics = [#tpu.dimension_semantics<parallel>, #tpu.dimension_semantics<arbitrary>], iteration_bounds = array<i64: 1, 1>, scalar_prefetch = 0 : i64, scratch_operands = 1 : i64, tpu.core_type = #tpu.core_type<tc>, window_params = [{transform_indices = @transform_0, window_bounds = array<i64: 8, 8, 128>}, {transform_indices = @transform_1, window_bounds = array<i64: 8, 128, 128>}, {pipeline_mode = #tpu.pipeline_mode<synchronous>, transform_indices = @transform_2, window_bounds = array<i64: 1, 128>}, {transform_indices = @transform_3, window_bounds = array<i64: 8, 128>}]} {
    %c0_i32 = arith.constant 0 : i32
    %0 = arith.cmpi eq, %arg1, %c0_i32 : i32
    %1 = arith.extui %0 : i1 to i32
    %c0_i32_0 = arith.constant 0 : i32
    %2 = arith.cmpi ne, %1, %c0_i32_0 : i32
    scf.if %2 {
      %cst_46 = arith.constant 0.000000e+00 : f32
      %72 = vector.broadcast %cst_46 : f32 to vector<8x128xf32>
      %c0_47 = arith.constant 0 : index
      %c0_48 = arith.constant 0 : index
      %73 = vector.load %arg6[%c0_47, %c0_48] : memref<8x128xf32, #tpu.memory_space<vmem>>, vector<8x128xf32>
      tpu.vector_store %arg6[%c0_47, %c0_48], %72 {strides = array<i32>} : memref<8x128xf32, #tpu.memory_space<vmem>>, vector<8x128xf32>,
    } else {
    }
    %c0 = arith.constant 0 : index
    %c0_1 = arith.constant 0 : index
    %3 = vector.load %arg6[%c0, %c0_1] : memref<8x128xf32, #tpu.memory_space<vmem>>, vector<8x128xf32>
    %c0_i32_2 = arith.constant 0 : i32
    %4 = arith.index_cast %c0_i32_2 : i32 to index
    %c0_3 = arith.constant 0 : index
    %c0_4 = arith.constant 0 : index
    %5 = vector.load %arg2[%4, %c0_3, %c0_4] : memref<8x8x128xbf16, #tpu.memory_space<vmem>>, vector<1x8x128xbf16>
    %6 = vector.shape_cast %5 : vector<1x8x128xbf16> to vector<8x128xbf16>
    %7 = arith.index_cast %c0_i32_2 : i32 to index
    %c0_5 = arith.constant 0 : index
    %c0_6 = arith.constant 0 : index
    %8 = vector.load %arg3[%7, %c0_5, %c0_6] : memref<8x128x128xbf16, #tpu.memory_space<vmem>>, vector<1x128x128xbf16>
    %9 = vector.shape_cast %8 : vector<1x128x128xbf16> to vector<128x128xbf16>
    %cst = arith.constant dense<0.000000e+00> : vector<8x128xf32>
    %10 = tpu.matmul %6, %9, %cst {dimension_numbers = #tpu.dot_dimension_numbers<[1], [0], [0], [1], [0, 0, 1, 1], [], []>} : vector<8x128xbf16>, vector<128x128xbf16>, vector<8x128xf32> -> vector<8x128xf32>
    %11 = arith.addf %3, %10 : vector<8x128xf32>
    %c1_i32 = arith.constant 1 : i32
    %12 = arith.index_cast %c1_i32 : i32 to index
    %c0_7 = arith.constant 0 : index
    %c0_8 = arith.constant 0 : index
    %13 = vector.load %arg2[%12, %c0_7, %c0_8] : memref<8x8x128xbf16, #tpu.memory_space<vmem>>, vector<1x8x128xbf16>
    %14 = vector.shape_cast %13 : vector<1x8x128xbf16> to vector<8x128xbf16>
    %15 = arith.index_cast %c1_i32 : i32 to index
    %c0_9 = arith.constant 0 : index
    %c0_10 = arith.constant 0 : index
    %16 = vector.load %arg3[%15, %c0_9, %c0_10] : memref<8x128x128xbf16, #tpu.memory_space<vmem>>, vector<1x128x128xbf16>
    %17 = vector.shape_cast %16 : vector<1x128x128xbf16> to vector<128x128xbf16>
    %cst_11 = arith.constant dense<0.000000e+00> : vector<8x128xf32>
    %18 = tpu.matmul %14, %17, %cst_11 {dimension_numbers = #tpu.dot_dimension_numbers<[1], [0], [0], [1], [0, 0, 1, 1], [], []>} : vector<8x128xbf16>, vector<128x128xbf16>, vector<8x128xf32> -> vector<8x128xf32>
    %19 = arith.addf %11, %18 : vector<8x128xf32>
    %c2_i32 = arith.constant 2 : i32
    %20 = arith.index_cast %c2_i32 : i32 to index
    %c0_12 = arith.constant 0 : index
    %c0_13 = arith.constant 0 : index
    %21 = vector.load %arg2[%20, %c0_12, %c0_13] : memref<8x8x128xbf16, #tpu.memory_space<vmem>>, vector<1x8x128xbf16>
    %22 = vector.shape_cast %21 : vector<1x8x128xbf16> to vector<8x128xbf16>
    %23 = arith.index_cast %c2_i32 : i32 to index
    %c0_14 = arith.constant 0 : index
    %c0_15 = arith.constant 0 : index
    %24 = vector.load %arg3[%23, %c0_14, %c0_15] : memref<8x128x128xbf16, #tpu.memory_space<vmem>>, vector<1x128x128xbf16>
    %25 = vector.shape_cast %24 : vector<1x128x128xbf16> to vector<128x128xbf16>
    %cst_16 = arith.constant dense<0.000000e+00> : vector<8x128xf32>
    %26 = tpu.matmul %22, %25, %cst_16 {dimension_numbers = #tpu.dot_dimension_numbers<[1], [0], [0], [1], [0, 0, 1, 1], [], []>} : vector<8x128xbf16>, vector<128x128xbf16>, vector<8x128xf32> -> vector<8x128xf32>
    %27 = arith.addf %19, %26 : vector<8x128xf32>
    %c3_i32 = arith.constant 3 : i32
    %28 = arith.index_cast %c3_i32 : i32 to index
    %c0_17 = arith.constant 0 : index
    %c0_18 = arith.constant 0 : index
    %29 = vector.load %arg2[%28, %c0_17, %c0_18] : memref<8x8x128xbf16, #tpu.memory_space<vmem>>, vector<1x8x128xbf16>
    %30 = vector.shape_cast %29 : vector<1x8x128xbf16> to vector<8x128xbf16>
    %31 = arith.index_cast %c3_i32 : i32 to index
    %c0_19 = arith.constant 0 : index
    %c0_20 = arith.constant 0 : index
    %32 = vector.load %arg3[%31, %c0_19, %c0_20] : memref<8x128x128xbf16, #tpu.memory_space<vmem>>, vector<1x128x128xbf16>
    %33 = vector.shape_cast %32 : vector<1x128x128xbf16> to vector<128x128xbf16>
    %cst_21 = arith.constant dense<0.000000e+00> : vector<8x128xf32>
    %34 = tpu.matmul %30, %33, %cst_21 {dimension_numbers = #tpu.dot_dimension_numbers<[1], [0], [0], [1], [0, 0, 1, 1], [], []>} : vector<8x128xbf16>, vector<128x128xbf16>, vector<8x128xf32> -> vector<8x128xf32>
    %35 = arith.addf %27, %34 : vector<8x128xf32>
    %c4_i32 = arith.constant 4 : i32
    %36 = arith.index_cast %c4_i32 : i32 to index
    %c0_22 = arith.constant 0 : index
    %c0_23 = arith.constant 0 : index
    %37 = vector.load %arg2[%36, %c0_22, %c0_23] : memref<8x8x128xbf16, #tpu.memory_space<vmem>>, vector<1x8x128xbf16>
    %38 = vector.shape_cast %37 : vector<1x8x128xbf16> to vector<8x128xbf16>
    %39 = arith.index_cast %c4_i32 : i32 to index
    %c0_24 = arith.constant 0 : index
    %c0_25 = arith.constant 0 : index
    %40 = vector.load %arg3[%39, %c0_24, %c0_25] : memref<8x128x128xbf16, #tpu.memory_space<vmem>>, vector<1x128x128xbf16>
    %41 = vector.shape_cast %40 : vector<1x128x128xbf16> to vector<128x128xbf16>
    %cst_26 = arith.constant dense<0.000000e+00> : vector<8x128xf32>
    %42 = tpu.matmul %38, %41, %cst_26 {dimension_numbers = #tpu.dot_dimension_numbers<[1], [0], [0], [1], [0, 0, 1, 1], [], []>} : vector<8x128xbf16>, vector<128x128xbf16>, vector<8x128xf32> -> vector<8x128xf32>
    %43 = arith.addf %35, %42 : vector<8x128xf32>
    %c5_i32 = arith.constant 5 : i32
    %44 = arith.index_cast %c5_i32 : i32 to index
    %c0_27 = arith.constant 0 : index
    %c0_28 = arith.constant 0 : index
    %45 = vector.load %arg2[%44, %c0_27, %c0_28] : memref<8x8x128xbf16, #tpu.memory_space<vmem>>, vector<1x8x128xbf16>
    %46 = vector.shape_cast %45 : vector<1x8x128xbf16> to vector<8x128xbf16>
    %47 = arith.index_cast %c5_i32 : i32 to index
    %c0_29 = arith.constant 0 : index
    %c0_30 = arith.constant 0 : index
    %48 = vector.load %arg3[%47, %c0_29, %c0_30] : memref<8x128x128xbf16, #tpu.memory_space<vmem>>, vector<1x128x128xbf16>
    %49 = vector.shape_cast %48 : vector<1x128x128xbf16> to vector<128x128xbf16>
    %cst_31 = arith.constant dense<0.000000e+00> : vector<8x128xf32>
    %50 = tpu.matmul %46, %49, %cst_31 {dimension_numbers = #tpu.dot_dimension_numbers<[1], [0], [0], [1], [0, 0, 1, 1], [], []>} : vector<8x128xbf16>, vector<128x128xbf16>, vector<8x128xf32> -> vector<8x128xf32>
    %51 = arith.addf %43, %50 : vector<8x128xf32>
    %c6_i32 = arith.constant 6 : i32
    %52 = arith.index_cast %c6_i32 : i32 to index
    %c0_32 = arith.constant 0 : index
    %c0_33 = arith.constant 0 : index
    %53 = vector.load %arg2[%52, %c0_32, %c0_33] : memref<8x8x128xbf16, #tpu.memory_space<vmem>>, vector<1x8x128xbf16>
    %54 = vector.shape_cast %53 : vector<1x8x128xbf16> to vector<8x128xbf16>
    %55 = arith.index_cast %c6_i32 : i32 to index
    %c0_34 = arith.constant 0 : index
    %c0_35 = arith.constant 0 : index
    %56 = vector.load %arg3[%55, %c0_34, %c0_35] : memref<8x128x128xbf16, #tpu.memory_space<vmem>>, vector<1x128x128xbf16>
    %57 = vector.shape_cast %56 : vector<1x128x128xbf16> to vector<128x128xbf16>
    %cst_36 = arith.constant dense<0.000000e+00> : vector<8x128xf32>
    %58 = tpu.matmul %54, %57, %cst_36 {dimension_numbers = #tpu.dot_dimension_numbers<[1], [0], [0], [1], [0, 0, 1, 1], [], []>} : vector<8x128xbf16>, vector<128x128xbf16>, vector<8x128xf32> -> vector<8x128xf32>
    %59 = arith.addf %51, %58 : vector<8x128xf32>
    %c7_i32 = arith.constant 7 : i32
    %60 = arith.index_cast %c7_i32 : i32 to index
    %c0_37 = arith.constant 0 : index
    %c0_38 = arith.constant 0 : index
    %61 = vector.load %arg2[%60, %c0_37, %c0_38] : memref<8x8x128xbf16, #tpu.memory_space<vmem>>, vector<1x8x128xbf16>
    %62 = vector.shape_cast %61 : vector<1x8x128xbf16> to vector<8x128xbf16>
    %63 = arith.index_cast %c7_i32 : i32 to index
    %c0_39 = arith.constant 0 : index
    %c0_40 = arith.constant 0 : index
    %64 = vector.load %arg3[%63, %c0_39, %c0_40] : memref<8x128x128xbf16, #tpu.memory_space<vmem>>, vector<1x128x128xbf16>
    %65 = vector.shape_cast %64 : vector<1x128x128xbf16> to vector<128x128xbf16>
    %cst_41 = arith.constant dense<0.000000e+00> : vector<8x128xf32>
    %66 = tpu.matmul %62, %65, %cst_41 {dimension_numbers = #tpu.dot_dimension_numbers<[1], [0], [0], [1], [0, 0, 1, 1], [], []>} : vector<8x128xbf16>, vector<128x128xbf16>, vector<8x128xf32> -> vector<8x128xf32>
    %67 = arith.addf %59, %66 : vector<8x128xf32>
    %c8_i32 = arith.constant 8 : i32
    %c0_42 = arith.constant 0 : index
    %c0_43 = arith.constant 0 : index
    %68 = vector.load %arg6[%c0_42, %c0_43] : memref<8x128xf32, #tpu.memory_space<vmem>>, vector<8x128xf32>
    tpu.vector_store %arg6[%c0_42, %c0_43], %67 {strides = array<i32>} : memref<8x128xf32, #tpu.memory_space<vmem>>, vector<8x128xf32>,
    %c0_i32_44 = arith.constant 0 : i32
    %69 = arith.cmpi eq, %arg1, %c0_i32_44 : i32
    %70 = arith.extui %69 : i1 to i32
    %c0_i32_45 = arith.constant 0 : i32
    %71 = arith.cmpi ne, %70, %c0_i32_45 : i32
    scf.if %71 {
      %c0_46 = arith.constant 0 : index
      %c0_47 = arith.constant 0 : index
      %72 = vector.load %arg6[%c0_46, %c0_47] : memref<8x128xf32, #tpu.memory_space<vmem>>, vector<8x128xf32>
      %c0_48 = arith.constant 0 : index
      %c0_49 = arith.constant 0 : index
      %73 = vector.load %arg4[%c0_48, %c0_49] : memref<1x128xf32, #tpu.memory_space<vmem>>, vector<1x128xf32>
      %74 = vector.broadcast %73 : vector<1x128xf32> to vector<8x128xf32>
      %75 = arith.addf %72, %74 : vector<8x128xf32>
      %76 = arith.negf %75 : vector<8x128xf32>
      %77 = math.exp %76 : vector<8x128xf32>
      %cst_50 = arith.constant 1.000000e+00 : f32
      %78 = vector.broadcast %cst_50 : f32 to vector<8x128xf32>
      %79 = arith.addf %78, %77 : vector<8x128xf32>
      %80 = arith.divf %78, %79 : vector<8x128xf32>
      %c0_51 = arith.constant 0 : index
      %c0_52 = arith.constant 0 : index
      %81 = vector.load %arg5[%c0_51, %c0_52] : memref<8x128xf32, #tpu.memory_space<vmem>>, vector<8x128xf32>
      tpu.vector_store %arg5[%c0_51, %c0_52], %80 {strides = array<i32>} : memref<8x128xf32, #tpu.memory_space<vmem>>, vector<8x128xf32>,
    } else {
    }
    return
  }
  func.func @transform_0(%arg0: i32, %arg1: i32) -> (i32, i32, i32) {
    %c0_i32 = arith.constant 0 : i32
    %c0_i32_0 = arith.constant 0 : i32
    return %arg1, %arg0, %c0_i32 : i32, i32, i32
  }
  func.func @transform_1(%arg0: i32, %arg1: i32) -> (i32, i32, i32) {
    %c0_i32 = arith.constant 0 : i32
    %c0_i32_0 = arith.constant 0 : i32
    %c0_i32_1 = arith.constant 0 : i32
    return %arg1, %c0_i32, %c0_i32_0 : i32, i32, i32
  }
  func.func @transform_2(%arg0: i32, %arg1: i32) -> (i32, i32) {
    %c0_i32 = arith.constant 0 : i32
    %c0_i32_0 = arith.constant 0 : i32
    %c0_i32_1 = arith.constant 0 : i32
    return %c0_i32, %c0_i32_0 : i32, i32
  }
  func.func @transform_3(%arg0: i32, %arg1: i32) -> (i32, i32) {
    %c0_i32 = arith.constant 0 : i32
    %c0_i32_0 = arith.constant 0 : i32
    return %arg0, %c0_i32 : i32, i32
  }
}

</mosaic_0001>

<bundles_post_ra>
// kernel: lstm_model_forward.3
= control target key start
LH: loop header
LB: loop body
LE: loop exit
PB: predicated region body
PF: predicated region fallthrough
CT: control target
= control target key end

     0   :  { %8 = vsyncpa [#allocation3], 0  ;;  %s660_s0 = inlined_call_operand.vmem [shape: bf16[64,16], index: 0, kind: input, shape index: {}]   ;;  %s661_s1 = inlined_call_operand.hbm [shape: bf16[16,512], index: 1, kind: input, shape index: {}]   ;;  %s662_s2 = inlined_call_operand.hbm [shape: f32[1,512], index: 2, kind: input, shape index: {}]   ;;  %s663_s3 = inlined_call_operand.vmem [shape: bf16[64,512], index: 3, kind: output, shape index: {}]  }
   0x1   :  { %9 = vsyncpa [#allocation5], 0  ;;  %s503_s12 = smov [#allocation2]   ;;  %s455_s16 = scalar_lea.hbm %s661_s1, 512 }
   0x2   :  { %s17_s13 = sshll.u32 %s503_s12, 4  ;;  %p456_p0 = scmp.ne.s32.totalorder %s661_s1, %s455_s16  ;;  %s18_s13 = int_to_ptr.vmem [resolvable:$true] %s17_s13 }
   0x3   :  { %p459_p1 = scmp.lt.u32.totalorder %s455_s16, %s661_s1 }
   0x5   :  { %p461_p2 = pnand %p459_p1, %p456_p0 }
   0x7   :  { %464 = shalt.err (!%p461_p2)
}
   0x8   :  { %s465_s21 = scalar_lea.vmem %s18_s13, 512  ;;  %p470_p4 = scmp.lt.s32.totalorder %s18_s13, %s18_s13 }
   0x9   :  { %p466_p3 = scmp.ne.s32.totalorder %s18_s13, %s465_s21  ;;  %p471_p5 = scmp.lt.s32.totalorder %s465_s21, %s465_s21 }
   0xb   :  { %p472_p6 = por %p471_p5, %p470_p4 }
   0xd   :  { %p473_p7 = pnand %p472_p6, %p466_p3 }
   0xf   :  { %476 = shalt.err (!%p473_p7)
}
  0x10   :  { %s504_s22 = smov 256   ;;  %s505_s23 = smov 16  }
  0x11   :  { %23 = dma.hbm_to_vmem [thread:$0]  %s661_s1, 512, %s18_s13, [#allocation3], %s504_s22, %s504_s22, %s505_s23  }
  0x12   :  { %s506_s26 = smov [#allocation4]   ;;  %s477_s30 = scalar_lea.hbm %s662_s2, 64 }
  0x13   :  { %s30_s27 = sshll.u32 %s506_s26, 4  ;;  %p478_p8 = scmp.ne.s32.totalorder %s662_s2, %s477_s30  ;;  %s31_s27 = int_to_ptr.vmem [resolvable:$true] %s30_s27 }
  0x14   :  { %p481_p9 = scmp.lt.u32.totalorder %s477_s30, %s662_s2 }
  0x16   :  { %p483_p10 = pnand %p481_p9, %p478_p8 }
  0x18   :  { %486 = shalt.err (!%p483_p10)
}
  0x19   :  { %s487_s8 = scalar_lea.vmem %s31_s27, 64  ;;  %p492_p12 = scmp.lt.s32.totalorder %s31_s27, %s31_s27 }
  0x1a   :  { %p488_p11 = scmp.ne.s32.totalorder %s31_s27, %s487_s8  ;;  %p493_p13 = scmp.lt.s32.totalorder %s487_s8, %s487_s8 }
  0x1c   :  { %p494_p0 = por %p493_p13, %p492_p12 }
  0x1e   :  { %p495_p1 = pnand %p494_p0, %p488_p11 }
  0x20   :  { %498 = shalt.err (!%p495_p1)
}
  0x21   :  { %33 = dma.hbm_to_vmem [thread:$0]  %s662_s2, 64, %s31_s27, [#allocation5]  }
  0x22   :  { %499 = dma.done.wait [#allocation3], 512  }
  0x23   :  { %500 = vsyncadd [#allocation3], 4294966784 }
  0x24   :  { %501 = dma.done.wait [#allocation5], 64  }
  0x25   :  { %502 = vsyncadd [#allocation5], 4294967232  ;;  %v507_v0 = vmov 0   ;;  %v445_v1 = vld [vmem:[#allocation2 + $0x4] ss:$16 sps:$4 sm:$0xff]   ;;  %vm115_vm0 = vcmask 130048   ;;  %v55_v9 = vlaneseq }
  0x26   :  { %160 = vmatprep.mubr.bf16.mxu0 %v507_v0  ;;  %233 = vmatprep.mubr.bf16.mxu1 %v507_v0  ;;  %v447_v2 = vld [vmem:[#allocation2 + $0xc] ss:$16 sps:$4 sm:$0xff]   ;;  %v449_v3 = vld [vmem:[#allocation2] ss:$16 sps:$4 sm:$0xff]   ;;  %v450_v4 = vld [vmem:[#allocation2 + $0x8] ss:$16 sps:$4 sm:$0xff]  }
  0x27   :  { %128 = vmatprep.subr.bf16.mxu0 %v445_v1  ;;  %201 = vmatprep.subr.bf16.mxu1 %v447_v2  ;;  %v451_v5 = vld [vmem:[%s660_s0] sm:$0xff]   ;;  %v452_v6 = vld [vmem:[%s660_s0 + $0x8] sm:$0xff]   ;;  %v453_v7 = vld [vmem:[%s660_s0 + $0x10] sm:$0xff]   ;;  %v56_v10 = vshrl.u32 %v55_v9, 7 }
  0x28   :  { %129 = vmatpush1.bf16.msra.mxu0 %v449_v3  ;;  %202 = vmatpush1.bf16.msra.mxu1 %v450_v4  ;;  %v454_v8 = vld [vmem:[%s660_s0 + $0x18] sm:$0xff]   ;;  %v53_v13 = vld [vmem:[#allocation4] sm:$0xf] }
  0x29   :  { %v57_v11 = vsub.s32 0, %v56_v10  ;;  %v65_v12 = vsub.s32 2, %v56_v10  ;;  %v61_v14 = vsub.s32 1, %v56_v10  ;;  %v69_v15 = vsub.s32 3, %v56_v10 }
  0x2b   :  { %400 = vmatmul.mubr.msk.bf16.vlgmr.msra.gmra.mrb[0].mxu0 %vm115_vm0, %v451_v5  ;;  %404 = vmatmul.mubr.msk.bf16.vlgmr.msra.gmra.mrb[0].mxu1 %vm115_vm0, %v451_v5  ;;  %v572_v16 = vrot.slane %v53_v13, %v57_v11  ;;  %v574_v17 = vrot.slane %v53_v13, %v65_v12  ;;  %v576_v18 = vrot.slane %v53_v13, %v61_v14 }
  0x2c   :  { %170 = vmatprep.mubr.bf16.mxu0 %v507_v0  ;;  %243 = vmatprep.mubr.bf16.mxu1 %v507_v0  ;;  %v578_v19 = vrot.slane %v53_v13, %v69_v15 }
  0x33   :  { %401 = vmatmul.mubr.msk.bf16.gmra.mrb[4].mxu0 %vm115_vm0, %v452_v6  ;;  %405 = vmatmul.mubr.msk.bf16.gmra.mrb[4].mxu1 %vm115_vm0, %v452_v6 }
  0x34   :  { %180 = vmatprep.mubr.bf16.mxu0 %v507_v0  ;;  %253 = vmatprep.mubr.bf16.mxu1 %v507_v0 }
  0x3b   :  { %402 = vmatmul.mubr.msk.bf16.gmra.mrb[8].mxu0 %vm115_vm0, %v453_v7  ;;  %406 = vmatmul.mubr.msk.bf16.gmra.mrb[8].mxu1 %vm115_vm0, %v453_v7 }
  0x3c   :  { %190 = vmatprep.mubr.bf16.mxu0 %v507_v0  ;;  %263 = vmatprep.mubr.bf16.mxu1 %v507_v0 }
  0x43   :  { %403 = vmatmul.mubr.msk.bf16.gmra.mrb[12].mxu0 %vm115_vm0, %v454_v8  ;;  %407 = vmatmul.mubr.msk.bf16.gmra.mrb[12].mxu1 %vm115_vm0, %v454_v8 }
  0xfe   :  { %v162_v20 = vpop.f32.mrb[0].mxu0  ;;  %v235_v21 = vpop.f32.mrb[0].mxu1 }
  0xff   :  { %v163_v22 = vadd.f32 %v162_v20, %v572_v16  ;;  %v236_v23 = vadd.f32 %v235_v21, %v574_v17  ;;  %v164_v24 = vpop.f32.mrb[1].mxu0  ;;  %v237_v25 = vpop.f32.mrb[1].mxu1 }
 0x100   :  { %v165_v26 = vadd.f32 %v164_v24, %v576_v18  ;;  %v238_v27 = vadd.f32 %v237_v25, %v578_v19  ;;  %v166_v28 = vpop.f32.mrb[2].mxu0  ;;  %v239_v29 = vpop.f32.mrb[2].mxu1 }
 0x101   :  { %v167_v30 = vadd.f32 %v166_v28, %v572_v16  ;;  %v240_v31 = vadd.f32 %v239_v29, %v574_v17  ;;  %v168_v32 = vpop.f32.mrb[3].mxu0  ;;  %v241_v33 = vpop.f32.mrb[3].mxu1 }
 0x102   :  { %v424_v34 = vpack.c.bf16 %v165_v26, %v163_v22  ;;  %v425_v35 = vpack.c.bf16 %v238_v27, %v236_v23  ;;  %v169_v36 = vadd.f32 %v168_v32, %v576_v18  ;;  %v242_v37 = vadd.f32 %v241_v33, %v578_v19 }
 0x104   :  { %370 = vst [vmem:[%s663_s3] sm:$0xff] %v424_v34  ;;  %371 = vst [vmem:[%s663_s3 + $0x8] sm:$0xff] %v425_v35  ;;  %v426_v38 = vpack.c.bf16 %v169_v36, %v167_v30  ;;  %v427_v39 = vpack.c.bf16 %v242_v37, %v240_v31 }
 0x106   :  { %372 = vst [vmem:[%s663_s3 + $0x10] sm:$0xff] %v426_v38  ;;  %373 = vst [vmem:[%s663_s3 + $0x18] sm:$0xff] %v427_v39  ;;  %v172_v40 = vpop.f32.mrb[4].mxu0  ;;  %v245_v41 = vpop.f32.mrb[4].mxu1 }
 0x107   :  { %v173_v42 = vadd.f32 %v172_v40, %v572_v16  ;;  %v246_v43 = vadd.f32 %v245_v41, %v574_v17  ;;  %v174_v44 = vpop.f32.mrb[5].mxu0  ;;  %v247_v45 = vpop.f32.mrb[5].mxu1 }
 0x108   :  { %v175_v46 = vadd.f32 %v174_v44, %v576_v18  ;;  %v248_v47 = vadd.f32 %v247_v45, %v578_v19  ;;  %v176_v48 = vpop.f32.mrb[6].mxu0  ;;  %v249_v49 = vpop.f32.mrb[6].mxu1 }
 0x109   :  { %v177_v50 = vadd.f32 %v176_v48, %v572_v16  ;;  %v250_v51 = vadd.f32 %v249_v49, %v574_v17  ;;  %v178_v52 = vpop.f32.mrb[7].mxu0  ;;  %v251_v53 = vpop.f32.mrb[7].mxu1 }
 0x10a   :  { %v428_v54 = vpack.c.bf16 %v175_v46, %v173_v42  ;;  %v429_v55 = vpack.c.bf16 %v248_v47, %v246_v43  ;;  %v179_v56 = vadd.f32 %v178_v52, %v576_v18  ;;  %v252_v57 = vadd.f32 %v251_v53, %v578_v19 }
 0x10c   :  { %374 = vst [vmem:[%s663_s3 + $0x20] sm:$0xff] %v428_v54  ;;  %375 = vst [vmem:[%s663_s3 + $0x28] sm:$0xff] %v429_v55  ;;  %v430_v58 = vpack.c.bf16 %v179_v56, %v177_v50  ;;  %v431_v59 = vpack.c.bf16 %v252_v57, %v250_v51 }
 0x10e   :  { %376 = vst [vmem:[%s663_s3 + $0x30] sm:$0xff] %v430_v58  ;;  %377 = vst [vmem:[%s663_s3 + $0x38] sm:$0xff] %v431_v59  ;;  %v182_v60 = vpop.f32.mrb[8].mxu0  ;;  %v255_v61 = vpop.f32.mrb[8].mxu1 }
 0x10f   :  { %v183_v62 = vadd.f32 %v182_v60, %v572_v16  ;;  %v256_v63 = vadd.f32 %v255_v61, %v574_v17  ;;  %v184_v0 = vpop.f32.mrb[9].mxu0  ;;  %v257_v1 = vpop.f32.mrb[9].mxu1 }
 0x110   :  { %v185_v2 = vadd.f32 %v184_v0, %v576_v18  ;;  %v258_v3 = vadd.f32 %v257_v1, %v578_v19  ;;  %v186_v4 = vpop.f32.mrb[10].mxu0  ;;  %v259_v5 = vpop.f32.mrb[10].mxu1 }
 0x111   :  { %v187_v6 = vadd.f32 %v186_v4, %v572_v16  ;;  %v260_v7 = vadd.f32 %v259_v5, %v574_v17  ;;  %v188_v8 = vpop.f32.mrb[11].mxu0  ;;  %v261_v9 = vpop.f32.mrb[11].mxu1 }
 0x112   :  { %v432_v10 = vpack.c.bf16 %v185_v2, %v183_v62  ;;  %v433_v11 = vpack.c.bf16 %v258_v3, %v256_v63  ;;  %v189_v12 = vadd.f32 %v188_v8, %v576_v18  ;;  %v262_v13 = vadd.f32 %v261_v9, %v578_v19 }
 0x114   :  { %378 = vst [vmem:[%s663_s3 + $0x40] sm:$0xff] %v432_v10  ;;  %379 = vst [vmem:[%s663_s3 + $0x48] sm:$0xff] %v433_v11  ;;  %v434_v14 = vpack.c.bf16 %v189_v12, %v187_v6  ;;  %v435_v15 = vpack.c.bf16 %v262_v13, %v260_v7 }
 0x116   :  { %380 = vst [vmem:[%s663_s3 + $0x50] sm:$0xff] %v434_v14  ;;  %381 = vst [vmem:[%s663_s3 + $0x58] sm:$0xff] %v435_v15  ;;  %v192_v20 = vpop.f32.mrb[12].mxu0  ;;  %v265_v21 = vpop.f32.mrb[12].mxu1 }
 0x117   :  { %v193_v22 = vadd.f32 %v192_v20, %v572_v16  ;;  %v266_v23 = vadd.f32 %v265_v21, %v574_v17  ;;  %v194_v24 = vpop.f32.mrb[13].mxu0  ;;  %v267_v25 = vpop.f32.mrb[13].mxu1 }
 0x118   :  { %v195_v26 = vadd.f32 %v194_v24, %v576_v18  ;;  %v268_v27 = vadd.f32 %v267_v25, %v578_v19  ;;  %v196_v28 = vpop.f32.mrb[14].mxu0  ;;  %v269_v29 = vpop.f32.mrb[14].mxu1 }
 0x119   :  { %v197_v30 = vadd.f32 %v196_v28, %v572_v16  ;;  %v270_v31 = vadd.f32 %v269_v29, %v574_v17  ;;  %v198_v32 = vpop.f32.mrb[15].mxu0  ;;  %v271_v33 = vpop.f32.mrb[15].mxu1 }
 0x11a   :  { %v436_v34 = vpack.c.bf16 %v195_v26, %v193_v22  ;;  %v437_v35 = vpack.c.bf16 %v268_v27, %v266_v23  ;;  %v199_v36 = vadd.f32 %v198_v32, %v576_v18  ;;  %v272_v37 = vadd.f32 %v271_v33, %v578_v19 }
 0x11c   :  { %382 = vst [vmem:[%s663_s3 + $0x60] sm:$0xff] %v436_v34  ;;  %383 = vst [vmem:[%s663_s3 + $0x68] sm:$0xff] %v437_v35  ;;  %v438_v38 = vpack.c.bf16 %v199_v36, %v197_v30  ;;  %v439_v16 = vpack.c.bf16 %v272_v37, %v270_v31 }
 0x11e   :  { %384 = vst [vmem:[%s663_s3 + $0x70] sm:$0xff] %v438_v38  ;;  %385 = vst [vmem:[%s663_s3 + $0x78] sm:$0xff] %v439_v16 }
 0x11f   :  { %390 = vsyncpa [#allocation3], 1 }
 0x120   :  { %391 = vsyncpa [#allocation5], 1 }

// kernel: lstm_model_forward.4
= control target key start
LH: loop header
LB: loop body
LE: loop exit
PB: predicated region body
PF: predicated region fallthrough
CT: control target
= control target key end

     0   :  { %7 = vsyncpa [#allocation5], 0  ;;  %s1386_s9 = smov [#allocation4]   ;;  %s1818_s0 = inlined_call_operand.vmem [shape: bf16[8,8,512], index: 0, kind: input, shape index: {}]   ;;  %s1819_s1 = inlined_call_operand.hbm [shape: bf16[128,512], index: 1, kind: input, shape index: {}]   ;;  %s1820_s2 = inlined_call_operand.vmem [shape: bf16[8,8,128], index: 2, kind: output, shape index: {}]  }
   0x1   :  { %s15_s10 = sshll.u32 %s1386_s9, 4  ;;  %s1362_s13 = scalar_lea.hbm %s1819_s1, 4096  ;;  %s16_s10 = int_to_ptr.vmem [resolvable:$true] %s15_s10 }
   0x2   :  { %p1363_p0 = scmp.ne.s32.totalorder %s1819_s1, %s1362_s13  ;;  %p1366_p1 = scmp.lt.u32.totalorder %s1362_s13, %s1819_s1 }
   0x4   :  { %p1368_p2 = pnand %p1366_p1, %p1363_p0 }
   0x6   :  { %1371 = shalt.err (!%p1368_p2)
}
   0x7   :  { %s1372_s18 = scalar_lea.vmem %s16_s10, 4096  ;;  %p1377_p4 = scmp.lt.s32.totalorder %s16_s10, %s16_s10 }
   0x8   :  { %p1373_p3 = scmp.ne.s32.totalorder %s16_s10, %s1372_s18  ;;  %p1378_p5 = scmp.lt.s32.totalorder %s1372_s18, %s1372_s18 }
   0xa   :  { %p1379_p6 = por %p1378_p5, %p1377_p4 }
   0xc   :  { %p1380_p7 = pnand %p1379_p6, %p1373_p3 }
   0xe   :  { %1383 = shalt.err (!%p1380_p7)
}
   0xf   :  { %s1387_s19 = smov 256   ;;  %s1388_s20 = smov 16  }
  0x10   :  { %21 = dma.hbm_to_vmem [thread:$0]  %s1819_s1, 4096, %s16_s10, [#allocation5], %s1387_s19, %s1387_s19, %s1388_s20  }
  0x11   :  { %1384 = dma.done.wait [#allocation5], 4096  }
  0x12   :  { %1385 = vsyncadd [#allocation5], 4294963200  ;;  %v1389_v0 = vmov 0   ;;  %v1420_v1 = vld [vmem:[#allocation4 + $0x4] ss:$16 sps:$4 sm:$0xff]   ;;  %v1390_v33 = vmov 0.0|0.0  }
  0x13   :  { %265 = vmatprep.mubr.bf16.mxu0 %v1389_v0  ;;  %306 = vmatprep.mubr.bf16.mxu1 %v1389_v0  ;;  %v1422_v2 = vld [vmem:[#allocation4] ss:$16 sps:$4 sm:$0xff]   ;;  %v1425_v3 = vld [vmem:[#allocation4 + $0xc] ss:$16 sps:$4 sm:$0xff]   ;;  %v1428_v4 = vld [vmem:[#allocation4 + $0x24] ss:$16 sps:$4 sm:$0xff]  }
  0x14   :  { %233 = vmatprep.subr.bf16.mxu0 %v1420_v1  ;;  %v1430_v5 = vld [vmem:[#allocation4 + $0x8] ss:$16 sps:$4 sm:$0xff]   ;;  %v1432_v6 = vld [vmem:[#allocation4 + $0x20] ss:$16 sps:$4 sm:$0xff]   ;;  %274 = vmatprep.subr.bf16.mxu1 %v1425_v3  ;;  %v1435_v7 = vld [vmem:[#allocation4 + $0x2c] ss:$16 sps:$4 sm:$0xff]  }
  0x15   :  { %234 = vmatpush1.bf16.msra.mxu0 %v1422_v2  ;;  %275 = vmatpush1.bf16.msra.mxu1 %v1430_v5  ;;  %v1439_v8 = vld [vmem:[#allocation4 + $0x44] ss:$16 sps:$4 sm:$0xff]   ;;  %v1442_v9 = vld [vmem:[#allocation4 + $0x28] ss:$16 sps:$4 sm:$0xff]   ;;  %v1444_v10 = vld [vmem:[#allocation4 + $0x40] ss:$16 sps:$4 sm:$0xff]  }
  0x16   :  { %235 = vmatprep.subr.bf16.mxu0 %v1428_v4  ;;  %276 = vmatprep.subr.bf16.mxu1 %v1435_v7  ;;  %v1447_v11 = vld [vmem:[#allocation4 + $0x4c] ss:$16 sps:$4 sm:$0xff]   ;;  %v1450_v12 = vld [vmem:[#allocation4 + $0x64] ss:$16 sps:$4 sm:$0xff]   ;;  %v1453_v13 = vld [vmem:[#allocation4 + $0x48] ss:$16 sps:$4 sm:$0xff]  }
  0x17   :  { %v1456_v14 = vld [vmem:[#allocation4 + $0x6c] ss:$16 sps:$4 sm:$0xff]   ;;  %v1459_v15 = vld [vmem:[#allocation4 + $0x60] ss:$16 sps:$4 sm:$0xff]   ;;  %v1462_v16 = vld [vmem:[#allocation4 + $0x84] ss:$16 sps:$4 sm:$0xff]  }
  0x18   :  { %v1465_v17 = vld [vmem:[#allocation4 + $0x68] ss:$16 sps:$4 sm:$0xff]   ;;  %v1468_v18 = vld [vmem:[#allocation4 + $0x8c] ss:$16 sps:$4 sm:$0xff]   ;;  %v1471_v19 = vld [vmem:[#allocation4 + $0x80] ss:$16 sps:$4 sm:$0xff]  }
  0x19   :  { %236 = vmatpush1.bf16.msra.mxu0 %v1432_v6  ;;  %277 = vmatpush1.bf16.msra.mxu1 %v1442_v9  ;;  %v1474_v20 = vld [vmem:[#allocation4 + $0xa4] ss:$16 sps:$4 sm:$0xff]   ;;  %v1477_v21 = vld [vmem:[#allocation4 + $0x88] ss:$16 sps:$4 sm:$0xff]   ;;  %v1480_v22 = vld [vmem:[#allocation4 + $0xac] ss:$16 sps:$4 sm:$0xff]  }
  0x1a   :  { %237 = vmatprep.subr.bf16.mxu0 %v1439_v8  ;;  %278 = vmatprep.subr.bf16.mxu1 %v1447_v11  ;;  %v1483_v23 = vld [vmem:[#allocation4 + $0xa0] ss:$16 sps:$4 sm:$0xff]   ;;  %v1486_v24 = vld [vmem:[#allocation4 + $0xc4] ss:$16 sps:$4 sm:$0xff]   ;;  %v1489_v25 = vld [vmem:[#allocation4 + $0xa8] ss:$16 sps:$4 sm:$0xff]  }
  0x1b   :  { %v1492_v26 = vld [vmem:[#allocation4 + $0xcc] ss:$16 sps:$4 sm:$0xff]   ;;  %v1495_v27 = vld [vmem:[#allocation4 + $0xc0] ss:$16 sps:$4 sm:$0xff]   ;;  %v1498_v28 = vld [vmem:[#allocation4 + $0xe4] ss:$16 sps:$4 sm:$0xff]  }
  0x1c   :  { %v1501_v29 = vld [vmem:[#allocation4 + $0xc8] ss:$16 sps:$4 sm:$0xff]   ;;  %v1504_v30 = vld [vmem:[#allocation4 + $0xec] ss:$16 sps:$4 sm:$0xff]   ;;  %v1507_v31 = vld [vmem:[#allocation4 + $0xe0] ss:$16 sps:$4 sm:$0xff]  }
  0x1d   :  { %238 = vmatpush1.bf16.msra.mxu0 %v1444_v10  ;;  %279 = vmatpush1.bf16.msra.mxu1 %v1453_v13  ;;  %v1511_v32 = vld [vmem:[#allocation4 + $0xe8] ss:$16 sps:$4 sm:$0xff]   ;;  %v66_v34 = vld [vmem:[%s1818_s0] sm:$0xff] }
  0x1e   :  { %239 = vmatprep.subr.bf16.mxu0 %v1450_v12  ;;  %280 = vmatprep.subr.bf16.mxu1 %v1456_v14  ;;  %v68_v35 = vunpack.c.l.bf16 %v66_v34  ;;  %v67_v36 = vld [vmem:[%s1818_s0 + $0x8] sm:$0xff]  ;;  %v69_v37 = vunpack.c.h.bf16 %v66_v34 }
  0x1f   :  { %v71_v39 = vunpack.c.h.bf16 %v67_v36  ;;  %v70_v51 = vunpack.c.l.bf16 %v67_v36 }
  0x21   :  { %240 = vmatpush1.bf16.msra.mxu0 %v1459_v15  ;;  %281 = vmatpush1.bf16.msra.mxu1 %v1465_v17 }
  0x22   :  { %241 = vmatprep.subr.bf16.mxu0 %v1462_v16  ;;  %282 = vmatprep.subr.bf16.mxu1 %v1468_v18 }
  0x25   :  { %242 = vmatpush1.bf16.msra.mxu0 %v1471_v19  ;;  %283 = vmatpush1.bf16.msra.mxu1 %v1477_v21 }
  0x26   :  { %243 = vmatprep.subr.bf16.mxu0 %v1474_v20  ;;  %284 = vmatprep.subr.bf16.mxu1 %v1480_v22 }
  0x29   :  { %244 = vmatpush1.bf16.msra.mxu0 %v1483_v23  ;;  %285 = vmatpush1.bf16.msra.mxu1 %v1489_v25 }
  0x2a   :  { %245 = vmatprep.subr.bf16.mxu0 %v1486_v24  ;;  %286 = vmatprep.subr.bf16.mxu1 %v1492_v26 }
  0x2d   :  { %246 = vmatpush1.bf16.msra.mxu0 %v1495_v27  ;;  %287 = vmatpush1.bf16.msra.mxu1 %v1501_v29 }
  0x2e   :  { %247 = vmatprep.subr.bf16.mxu0 %v1498_v28  ;;  %288 = vmatprep.subr.bf16.mxu1 %v1504_v30 }
  0x31   :  { %248 = vmatpush1.bf16.msra.mxu0 %v1507_v31  ;;  %289 = vmatpush1.bf16.msra.mxu1 %v1511_v32 }
  0x32   :  { %346 = vmatprep.subr.bf16.mxu0 %v1420_v1  ;;  %387 = vmatprep.subr.bf16.mxu1 %v1425_v3 }
  0x34   :  { %266 = vmatmul.mubr.bf16.vlgmr.msra.gmra.mrb[0].mxu0 %v1390_v33  ;;  %307 = vmatmul.mubr.bf16.vlgmr.msra.gmra.mrb[0].mxu1 %v1390_v33 }
  0x35   :  { %347 = vmatpush1.bf16.msra.mxu0 %v1422_v2  ;;  %378 = vmatprep.mubr.bf16.mxu0 %v1389_v0 }
  0x36   :  { %348 = vmatprep.subr.bf16.mxu0 %v1428_v4  ;;  %388 = vmatpush1.bf16.msra.mxu1 %v1430_v5 }
  0x37   :  { %419 = vmatprep.mubr.bf16.mxu1 %v1389_v0  ;;  %389 = vmatprep.subr.bf16.mxu1 %v1435_v7 }
  0x39   :  { %349 = vmatpush1.bf16.msra.mxu0 %v1432_v6 }
  0x3a   :  { %350 = vmatprep.subr.bf16.mxu0 %v1439_v8  ;;  %390 = vmatpush1.bf16.msra.mxu1 %v1442_v9 }
  0x3b   :  { %391 = vmatprep.subr.bf16.mxu1 %v1447_v11 }
  0x3d   :  { %351 = vmatpush1.bf16.msra.mxu0 %v1444_v10 }
  0x3e   :  { %352 = vmatprep.subr.bf16.mxu0 %v1450_v12  ;;  %392 = vmatpush1.bf16.msra.mxu1 %v1453_v13 }
  0x3f   :  { %393 = vmatprep.subr.bf16.mxu1 %v1456_v14 }
  0x41   :  { %353 = vmatpush1.bf16.msra.mxu0 %v1459_v15 }
  0x42   :  { %354 = vmatprep.subr.bf16.mxu0 %v1462_v16  ;;  %394 = vmatpush1.bf16.msra.mxu1 %v1465_v17 }
  0x43   :  { %395 = vmatprep.subr.bf16.mxu1 %v1468_v18 }
  0x45   :  { %355 = vmatpush1.bf16.msra.mxu0 %v1471_v19 }
  0x46   :  { %356 = vmatprep.subr.bf16.mxu0 %v1474_v20  ;;  %396 = vmatpush1.bf16.msra.mxu1 %v1477_v21 }
  0x47   :  { %397 = vmatprep.subr.bf16.mxu1 %v1480_v22 }
  0x49   :  { %357 = vmatpush1.bf16.msra.mxu0 %v1483_v23 }
  0x4a   :  { %358 = vmatprep.subr.bf16.mxu0 %v1486_v24  ;;  %398 = vmatpush1.bf16.msra.mxu1 %v1489_v25 }
  0x4b   :  { %399 = vmatprep.subr.bf16.mxu1 %v1492_v26 }
  0x4d   :  { %359 = vmatpush1.bf16.msra.mxu0 %v1495_v27 }
  0x4e   :  { %360 = vmatprep.subr.bf16.mxu0 %v1498_v28  ;;  %400 = vmatpush1.bf16.msra.mxu1 %v1501_v29 }
  0x4f   :  { %401 = vmatprep.subr.bf16.mxu1 %v1504_v30 }
  0x51   :  { %361 = vmatpush1.bf16.msra.mxu0 %v1507_v31 }
  0x52   :  { %460 = vmatprep.subr.bf16.mxu0 %v1420_v1  ;;  %402 = vmatpush1.bf16.msra.mxu1 %v1511_v32 }
  0x53   :  { %501 = vmatprep.subr.bf16.mxu1 %v1425_v3 }
 0x107   :  { %v267_v38 = vpop.f32.mrb[0].mxu0  ;;  %v308_v44 = vpop.f32.mrb[0].mxu1 }
 0x108   :  { %v315_v40 = vadd.f32 %v267_v38, %v68_v35  ;;  %v269_v41 = vpop.f32.mrb[1].mxu0  ;;  %v310_v47 = vpop.f32.mrb[1].mxu1  ;;  %v317_v53 = vadd.f32 %v308_v44, %v70_v51 }
 0x109   :  { %v316_v42 = vadd.f32 %v269_v41, %v69_v37  ;;  %v271_v43 = vpop.f32.mrb[2].mxu0  ;;  %v318_v49 = vadd.f32 %v310_v47, %v71_v39  ;;  %v312_v50 = vpop.f32.mrb[2].mxu1 }
 0x10a   :  { %v319_v45 = vmul.f32 0.5, %v315_v40  ;;  %v272_v46 = vpop.f32.mrb[3].mxu0  ;;  %v313_v52 = vpop.f32.mrb[3].mxu1  ;;  %v321_v54 = vmul.f32 0.5, %v317_v53  ;;  %v1176_v40 = vld [vmem:[%s1818_s0 + $0x10] sm:$0xff] }
 0x10b   :  { %v320_v48 = vmul.f32 0.5, %v316_v42  ;;  %v342_v41 = vunpack.c.l.bf16 %v1176_v40  ;;  %v1177_v42 = vld [vmem:[%s1818_s0 + $0x18] sm:$0xff]  ;;  %v343_v43 = vunpack.c.h.bf16 %v1176_v40 }
 0x10c   :  { %1250 = vtanh.f32 %v319_v45 }
 0x10d   :  { %1252 = vtanh.f32 %v320_v48  ;;  %v345_v48 = vunpack.c.h.bf16 %v1177_v42 }
 0x10e   :  { %1254 = vtanh.f32 %v318_v49 }
 0x10f   :  { %1256 = vtanh.f32 %v321_v54 }
 0x116   :  { %v1251_v55 = vpop.eup %1250 }
 0x117   :  { %v1253_v56 = vpop.eup %1252  ;;  %v325_v57 = vadd.f32 1.0, %v1251_v55 }
 0x118   :  { %v326_v58 = vadd.f32 1.0, %v1253_v56  ;;  %v1255_v59 = vpop.eup %1254 }
 0x119   :  { %v328_v60 = vmul.f32 0.5, %v325_v57  ;;  %v1257_v34 = vpop.eup %1256 }
 0x11a   :  { %v329_v61 = vmul.f32 0.5, %v326_v58  ;;  %v327_v35 = vadd.f32 1.0, %v1257_v34  ;;  %v344_v58 = vunpack.c.l.bf16 %v1177_v42 }
 0x11b   :  { %v333_v62 = vmul.f32 %v1255_v59, %v328_v60 }
 0x11c   :  { %v332_v63 = vmul.f32 0.0, %v329_v61  ;;  %v330_v36 = vmul.f32 0.5, %v327_v35 }
 0x11e   :  { %v1558_v33 = vadd.f32 %v333_v62, %v332_v63 }
 0x120   :  { %1258 = vtanh.f32 %v1558_v33 }
 0x12a   :  { %v1259_v37 = vpop.eup %1258 }
 0x12b   :  { %v336_v38 = vmul.f32 %v1259_v37, %v330_v36 }
 0x12d   :  { %v337_v39 = vpack.c.bf16 %v336_v38, %v336_v38 }
 0x12f   :  { %338 = vst [vmem:[%s1820_s2] sm:$0xf] %v337_v39  ;;  %379 = vmatmul.mubr.bf16.vlgmr.msra.gmra.mrb[4].mxu0 %v337_v39  ;;  %420 = vmatmul.mubr.bf16.vlgmr.msra.gmra.mrb[4].mxu1 %v337_v39 }
 0x130   :  { %461 = vmatpush1.bf16.msra.mxu0 %v1422_v2  ;;  %502 = vmatpush1.bf16.msra.mxu1 %v1430_v5 }
 0x131   :  { %462 = vmatprep.subr.bf16.mxu0 %v1428_v4  ;;  %503 = vmatprep.subr.bf16.mxu1 %v1435_v7 }
 0x132   :  { %492 = vmatprep.mubr.bf16.mxu0 %v1389_v0  ;;  %533 = vmatprep.mubr.bf16.mxu1 %v1389_v0 }
 0x134   :  { %463 = vmatpush1.bf16.msra.mxu0 %v1432_v6  ;;  %504 = vmatpush1.bf16.msra.mxu1 %v1442_v9 }
 0x135   :  { %464 = vmatprep.subr.bf16.mxu0 %v1439_v8  ;;  %505 = vmatprep.subr.bf16.mxu1 %v1447_v11 }
 0x138   :  { %465 = vmatpush1.bf16.msra.mxu0 %v1444_v10  ;;  %506 = vmatpush1.bf16.msra.mxu1 %v1453_v13 }
 0x139   :  { %466 = vmatprep.subr.bf16.mxu0 %v1450_v12  ;;  %507 = vmatprep.subr.bf16.mxu1 %v1456_v14 }
 0x13c   :  { %467 = vmatpush1.bf16.msra.mxu0 %v1459_v15  ;;  %508 = vmatpush1.bf16.msra.mxu1 %v1465_v17 }
 0x13d   :  { %468 = vmatprep.subr.bf16.mxu0 %v1462_v16  ;;  %509 = vmatprep.subr.bf16.mxu1 %v1468_v18 }
 0x140   :  { %469 = vmatpush1.bf16.msra.mxu0 %v1471_v19  ;;  %510 = vmatpush1.bf16.msra.mxu1 %v1477_v21 }
 0x141   :  { %470 = vmatprep.subr.bf16.mxu0 %v1474_v20  ;;  %511 = vmatprep.subr.bf16.mxu1 %v1480_v22 }
 0x144   :  { %471 = vmatpush1.bf16.msra.mxu0 %v1483_v23  ;;  %512 = vmatpush1.bf16.msra.mxu1 %v1489_v25 }
 0x145   :  { %472 = vmatprep.subr.bf16.mxu0 %v1486_v24  ;;  %513 = vmatprep.subr.bf16.mxu1 %v1492_v26 }
 0x148   :  { %473 = vmatpush1.bf16.msra.mxu0 %v1495_v27  ;;  %514 = vmatpush1.bf16.msra.mxu1 %v1501_v29 }
 0x149   :  { %474 = vmatprep.subr.bf16.mxu0 %v1498_v28  ;;  %515 = vmatprep.subr.bf16.mxu1 %v1504_v30 }
 0x14c   :  { %475 = vmatpush1.bf16.msra.mxu0 %v1507_v31  ;;  %516 = vmatpush1.bf16.msra.mxu1 %v1511_v32 }
 0x14d   :  { %574 = vmatprep.subr.bf16.mxu0 %v1420_v1  ;;  %615 = vmatprep.subr.bf16.mxu1 %v1425_v3 }
 0x202   :  { %v380_v44 = vpop.f32.mrb[4].mxu0  ;;  %v421_v45 = vpop.f32.mrb[4].mxu1 }
 0x203   :  { %v428_v46 = vadd.f32 %v380_v44, %v342_v41  ;;  %v382_v47 = vpop.f32.mrb[5].mxu0  ;;  %v423_v49 = vpop.f32.mrb[5].mxu1  ;;  %v430_v59 = vadd.f32 %v421_v45, %v344_v58 }
 0x204   :  { %v429_v50 = vadd.f32 %v382_v47, %v343_v43  ;;  %v384_v51 = vpop.f32.mrb[6].mxu0  ;;  %v425_v52 = vpop.f32.mrb[6].mxu1  ;;  %v431_v57 = vadd.f32 %v423_v49, %v345_v48  ;;  %v1180_v48 = vld [vmem:[%s1818_s0 + $0x28] sm:$0xff] }
 0x205   :  { %v432_v53 = vmul.f32 0.5, %v428_v46  ;;  %v385_v54 = vpop.f32.mrb[7].mxu0  ;;  %v426_v55 = vpop.f32.mrb[7].mxu1  ;;  %v434_v60 = vmul.f32 0.5, %v430_v59 }
 0x206   :  { %v433_v56 = vmul.f32 0.5, %v429_v50  ;;  %v459_v54 = vunpack.c.h.bf16 %v1180_v48 }
 0x207   :  { %1260 = vtanh.f32 %v432_v53 }
 0x208   :  { %1262 = vtanh.f32 %v433_v56 }
 0x209   :  { %1264 = vtanh.f32 %v431_v57 }
 0x20a   :  { %1266 = vtanh.f32 %v434_v60 }
 0x211   :  { %v1261_v61 = vpop.eup %1260 }
 0x212   :  { %v438_v62 = vadd.f32 1.0, %v1261_v61  ;;  %v1263_v63 = vpop.eup %1262 }
 0x213   :  { %v439_v35 = vadd.f32 1.0, %v1263_v63  ;;  %v1265_v36 = vpop.eup %1264 }
 0x214   :  { %v441_v34 = vmul.f32 0.5, %v438_v62  ;;  %v1267_v41 = vpop.eup %1266 }
 0x215   :  { %v442_v37 = vmul.f32 0.5, %v439_v35  ;;  %v440_v42 = vadd.f32 1.0, %v1267_v41 }
 0x216   :  { %v446_v38 = vmul.f32 %v1265_v36, %v441_v34  ;;  %v458_v34 = vunpack.c.l.bf16 %v1180_v48 }
 0x217   :  { %v445_v39 = vmul.f32 %v442_v37, %v1558_v33  ;;  %v443_v43 = vmul.f32 0.5, %v440_v42  ;;  %v1179_v33 = vld [vmem:[%s1818_s0 + $0x20] sm:$0xff] }
 0x218   :  { %v456_v47 = vunpack.c.l.bf16 %v1179_v33  ;;  %v457_v49 = vunpack.c.h.bf16 %v1179_v33 }
 0x219   :  { %v1605_v40 = vadd.f32 %v446_v38, %v445_v39 }
 0x21b   :  { %1268 = vtanh.f32 %v1605_v40 }
 0x225   :  { %v1269_v44 = vpop.eup %1268 }
 0x226   :  { %v449_v45 = vmul.f32 %v1269_v44, %v443_v43 }
 0x228   :  { %v450_v46 = vpack.c.bf16 %v449_v45, %v449_v45 }
 0x22a   :  { %1178 = vst [vmem:[%s1820_s2 + $0x4] sm:$0xf] %v450_v46  ;;  %493 = vmatmul.mubr.bf16.vlgmr.msra.gmra.mrb[8].mxu0 %v450_v46  ;;  %534 = vmatmul.mubr.bf16.vlgmr.msra.gmra.mrb[8].mxu1 %v450_v46 }
 0x22b   :  { %575 = vmatpush1.bf16.msra.mxu0 %v1422_v2  ;;  %616 = vmatpush1.bf16.msra.mxu1 %v1430_v5 }
 0x22c   :  { %576 = vmatprep.subr.bf16.mxu0 %v1428_v4  ;;  %617 = vmatprep.subr.bf16.mxu1 %v1435_v7 }
 0x22d   :  { %606 = vmatprep.mubr.bf16.mxu0 %v1389_v0  ;;  %647 = vmatprep.mubr.bf16.mxu1 %v1389_v0 }
 0x22f   :  { %577 = vmatpush1.bf16.msra.mxu0 %v1432_v6  ;;  %618 = vmatpush1.bf16.msra.mxu1 %v1442_v9 }
 0x230   :  { %578 = vmatprep.subr.bf16.mxu0 %v1439_v8  ;;  %619 = vmatprep.subr.bf16.mxu1 %v1447_v11 }
 0x233   :  { %579 = vmatpush1.bf16.msra.mxu0 %v1444_v10  ;;  %620 = vmatpush1.bf16.msra.mxu1 %v1453_v13 }
 0x234   :  { %580 = vmatprep.subr.bf16.mxu0 %v1450_v12  ;;  %621 = vmatprep.subr.bf16.mxu1 %v1456_v14 }
 0x237   :  { %581 = vmatpush1.bf16.msra.mxu0 %v1459_v15  ;;  %622 = vmatpush1.bf16.msra.mxu1 %v1465_v17 }
 0x238   :  { %582 = vmatprep.subr.bf16.mxu0 %v1462_v16  ;;  %623 = vmatprep.subr.bf16.mxu1 %v1468_v18 }
 0x23b   :  { %583 = vmatpush1.bf16.msra.mxu0 %v1471_v19  ;;  %624 = vmatpush1.bf16.msra.mxu1 %v1477_v21 }
 0x23c   :  { %584 = vmatprep.subr.bf16.mxu0 %v1474_v20  ;;  %625 = vmatprep.subr.bf16.mxu1 %v1480_v22 }
 0x23f   :  { %585 = vmatpush1.bf16.msra.mxu0 %v1483_v23  ;;  %626 = vmatpush1.bf16.msra.mxu1 %v1489_v25 }
 0x240   :  { %586 = vmatprep.subr.bf16.mxu0 %v1486_v24  ;;  %627 = vmatprep.subr.bf16.mxu1 %v1492_v26 }
 0x243   :  { %587 = vmatpush1.bf16.msra.mxu0 %v1495_v27  ;;  %628 = vmatpush1.bf16.msra.mxu1 %v1501_v29 }
 0x244   :  { %588 = vmatprep.subr.bf16.mxu0 %v1498_v28  ;;  %629 = vmatprep.subr.bf16.mxu1 %v1504_v30 }
 0x247   :  { %589 = vmatpush1.bf16.msra.mxu0 %v1507_v31  ;;  %630 = vmatpush1.bf16.msra.mxu1 %v1511_v32 }
 0x248   :  { %688 = vmatprep.subr.bf16.mxu0 %v1420_v1  ;;  %729 = vmatprep.subr.bf16.mxu1 %v1425_v3 }
 0x2fd   :  { %v494_v50 = vpop.f32.mrb[8].mxu0  ;;  %v535_v51 = vpop.f32.mrb[8].mxu1 }
 0x2fe   :  { %v542_v52 = vadd.f32 %v494_v50, %v456_v47  ;;  %v496_v53 = vpop.f32.mrb[9].mxu0  ;;  %v537_v55 = vpop.f32.mrb[9].mxu1  ;;  %v544_v35 = vadd.f32 %v535_v51, %v458_v34 }
 0x2ff   :  { %v543_v56 = vadd.f32 %v496_v53, %v457_v49  ;;  %v498_v57 = vpop.f32.mrb[10].mxu0  ;;  %v539_v58 = vpop.f32.mrb[10].mxu1  ;;  %v545_v63 = vadd.f32 %v537_v55, %v459_v54  ;;  %v1183_v54 = vld [vmem:[%s1818_s0 + $0x38] sm:$0xff] }
 0x300   :  { %v546_v59 = vmul.f32 0.5, %v542_v52  ;;  %v499_v60 = vpop.f32.mrb[11].mxu0  ;;  %v540_v61 = vpop.f32.mrb[11].mxu1  ;;  %v548_v36 = vmul.f32 0.5, %v544_v35 }
 0x301   :  { %v547_v62 = vmul.f32 0.5, %v543_v56  ;;  %v573_v60 = vunpack.c.h.bf16 %v1183_v54 }
 0x302   :  { %1270 = vtanh.f32 %v546_v59 }
 0x303   :  { %1272 = vtanh.f32 %v547_v62 }
 0x304   :  { %1274 = vtanh.f32 %v545_v63 }
 0x305   :  { %1276 = vtanh.f32 %v548_v36 }
 0x30c   :  { %v1271_v37 = vpop.eup %1270 }
 0x30d   :  { %v552_v38 = vadd.f32 1.0, %v1271_v37  ;;  %v1273_v39 = vpop.eup %1272 }
 0x30e   :  { %v553_v42 = vadd.f32 1.0, %v1273_v39  ;;  %v1275_v43 = vpop.eup %1274 }
 0x30f   :  { %v555_v41 = vmul.f32 0.5, %v552_v38  ;;  %v1277_v47 = vpop.eup %1276 }
 0x310   :  { %v556_v44 = vmul.f32 0.5, %v553_v42  ;;  %v554_v48 = vadd.f32 1.0, %v1277_v47 }
 0x311   :  { %v560_v45 = vmul.f32 %v1275_v43, %v555_v41  ;;  %v572_v41 = vunpack.c.l.bf16 %v1183_v54 }
 0x312   :  { %v559_v46 = vmul.f32 %v556_v44, %v1605_v40  ;;  %v557_v49 = vmul.f32 0.5, %v554_v48  ;;  %v1182_v40 = vld [vmem:[%s1818_s0 + $0x30] sm:$0xff] }
 0x313   :  { %v570_v53 = vunpack.c.l.bf16 %v1182_v40  ;;  %v571_v55 = vunpack.c.h.bf16 %v1182_v40 }
 0x314   :  { %v1652_v33 = vadd.f32 %v560_v45, %v559_v46 }
 0x316   :  { %1278 = vtanh.f32 %v1652_v33 }
 0x320   :  { %v1279_v50 = vpop.eup %1278 }
 0x321   :  { %v563_v51 = vmul.f32 %v1279_v50, %v557_v49 }
 0x323   :  { %v564_v52 = vpack.c.bf16 %v563_v51, %v563_v51 }
 0x325   :  { %1181 = vst [vmem:[%s1820_s2 + $0x8] sm:$0xf] %v564_v52  ;;  %607 = vmatmul.mubr.bf16.vlgmr.msra.gmra.mrb[12].mxu0 %v564_v52  ;;  %648 = vmatmul.mubr.bf16.vlgmr.msra.gmra.mrb[12].mxu1 %v564_v52 }
 0x326   :  { %689 = vmatpush1.bf16.msra.mxu0 %v1422_v2  ;;  %730 = vmatpush1.bf16.msra.mxu1 %v1430_v5 }
 0x327   :  { %690 = vmatprep.subr.bf16.mxu0 %v1428_v4  ;;  %731 = vmatprep.subr.bf16.mxu1 %v1435_v7 }
 0x328   :  { %720 = vmatprep.mubr.bf16.mxu0 %v1389_v0  ;;  %761 = vmatprep.mubr.bf16.mxu1 %v1389_v0 }
 0x32a   :  { %691 = vmatpush1.bf16.msra.mxu0 %v1432_v6  ;;  %732 = vmatpush1.bf16.msra.mxu1 %v1442_v9 }
 0x32b   :  { %692 = vmatprep.subr.bf16.mxu0 %v1439_v8  ;;  %733 = vmatprep.subr.bf16.mxu1 %v1447_v11 }
 0x32e   :  { %693 = vmatpush1.bf16.msra.mxu0 %v1444_v10  ;;  %734 = vmatpush1.bf16.msra.mxu1 %v1453_v13 }
 0x32f   :  { %694 = vmatprep.subr.bf16.mxu0 %v1450_v12  ;;  %735 = vmatprep.subr.bf16.mxu1 %v1456_v14 }
 0x332   :  { %695 = vmatpush1.bf16.msra.mxu0 %v1459_v15  ;;  %736 = vmatpush1.bf16.msra.mxu1 %v1465_v17 }
 0x333   :  { %696 = vmatprep.subr.bf16.mxu0 %v1462_v16  ;;  %737 = vmatprep.subr.bf16.mxu1 %v1468_v18 }
 0x336   :  { %697 = vmatpush1.bf16.msra.mxu0 %v1471_v19  ;;  %738 = vmatpush1.bf16.msra.mxu1 %v1477_v21 }
 0x337   :  { %698 = vmatprep.subr.bf16.mxu0 %v1474_v20  ;;  %739 = vmatprep.subr.bf16.mxu1 %v1480_v22 }
 0x33a   :  { %699 = vmatpush1.bf16.msra.mxu0 %v1483_v23  ;;  %740 = vmatpush1.bf16.msra.mxu1 %v1489_v25 }
 0x33b   :  { %700 = vmatprep.subr.bf16.mxu0 %v1486_v24  ;;  %741 = vmatprep.subr.bf16.mxu1 %v1492_v26 }
 0x33e   :  { %701 = vmatpush1.bf16.msra.mxu0 %v1495_v27  ;;  %742 = vmatpush1.bf16.msra.mxu1 %v1501_v29 }
 0x33f   :  { %702 = vmatprep.subr.bf16.mxu0 %v1498_v28  ;;  %743 = vmatprep.subr.bf16.mxu1 %v1504_v30 }
 0x342   :  { %703 = vmatpush1.bf16.msra.mxu0 %v1507_v31  ;;  %744 = vmatpush1.bf16.msra.mxu1 %v1511_v32 }
 0x343   :  { %802 = vmatprep.subr.bf16.mxu0 %v1420_v1  ;;  %843 = vmatprep.subr.bf16.mxu1 %v1425_v3 }
 0x3f8   :  { %v608_v56 = vpop.f32.mrb[12].mxu0  ;;  %v649_v57 = vpop.f32.mrb[12].mxu1 }
 0x3f9   :  { %v656_v58 = vadd.f32 %v608_v56, %v570_v53  ;;  %v610_v59 = vpop.f32.mrb[13].mxu0  ;;  %v651_v61 = vpop.f32.mrb[13].mxu1  ;;  %v658_v42 = vadd.f32 %v649_v57, %v572_v41 }
 0x3fa   :  { %v657_v62 = vadd.f32 %v610_v59, %v571_v55  ;;  %v612_v63 = vpop.f32.mrb[14].mxu0  ;;  %v653_v34 = vpop.f32.mrb[14].mxu1  ;;  %v659_v39 = vadd.f32 %v651_v61, %v573_v60  ;;  %v1186_v60 = vld [vmem:[%s1818_s0 + $0x48] sm:$0xff] }
 0x3fb   :  { %v660_v35 = vmul.f32 0.5, %v656_v58  ;;  %v613_v36 = vpop.f32.mrb[15].mxu0  ;;  %v654_v37 = vpop.f32.mrb[15].mxu1  ;;  %v662_v43 = vmul.f32 0.5, %v658_v42 }
 0x3fc   :  { %v661_v38 = vmul.f32 0.5, %v657_v62  ;;  %v687_v36 = vunpack.c.h.bf16 %v1186_v60 }
 0x3fd   :  { %1280 = vtanh.f32 %v660_v35 }
 0x3fe   :  { %1282 = vtanh.f32 %v661_v38 }
 0x3ff   :  { %1284 = vtanh.f32 %v659_v39 }
 0x400   :  { %1286 = vtanh.f32 %v662_v43 }
 0x407   :  { %v1281_v44 = vpop.eup %1280 }
 0x408   :  { %v666_v45 = vadd.f32 1.0, %v1281_v44  ;;  %v1283_v46 = vpop.eup %1282 }
 0x409   :  { %v667_v48 = vadd.f32 1.0, %v1283_v46  ;;  %v1285_v49 = vpop.eup %1284 }
 0x40a   :  { %v669_v47 = vmul.f32 0.5, %v666_v45  ;;  %v1287_v53 = vpop.eup %1286  ;;  %v686_v45 = vunpack.c.l.bf16 %v1186_v60 }
 0x40b   :  { %v670_v50 = vmul.f32 0.5, %v667_v48  ;;  %v668_v54 = vadd.f32 1.0, %v1287_v53 }
 0x40c   :  { %v674_v51 = vmul.f32 %v1285_v49, %v669_v47 }
 0x40d   :  { %v673_v52 = vmul.f32 %v670_v50, %v1652_v33  ;;  %v671_v55 = vmul.f32 0.5, %v668_v54  ;;  %v1185_v33 = vld [vmem:[%s1818_s0 + $0x40] sm:$0xff] }
 0x40e   :  { %v684_v59 = vunpack.c.l.bf16 %v1185_v33  ;;  %v685_v61 = vunpack.c.h.bf16 %v1185_v33 }
 0x40f   :  { %v1699_v40 = vadd.f32 %v674_v51, %v673_v52 }
 0x411   :  { %1288 = vtanh.f32 %v1699_v40 }
 0x41b   :  { %v1289_v56 = vpop.eup %1288 }
 0x41c   :  { %v677_v57 = vmul.f32 %v1289_v56, %v671_v55 }
 0x41e   :  { %v678_v58 = vpack.c.bf16 %v677_v57, %v677_v57 }
 0x420   :  { %1184 = vst [vmem:[%s1820_s2 + $0xc] sm:$0xf] %v678_v58  ;;  %721 = vmatmul.mubr.bf16.vlgmr.msra.gmra.mrb[16].mxu0 %v678_v58  ;;  %762 = vmatmul.mubr.bf16.vlgmr.msra.gmra.mrb[16].mxu1 %v678_v58 }
 0x421   :  { %803 = vmatpush1.bf16.msra.mxu0 %v1422_v2  ;;  %844 = vmatpush1.bf16.msra.mxu1 %v1430_v5 }
 0x422   :  { %804 = vmatprep.subr.bf16.mxu0 %v1428_v4  ;;  %845 = vmatprep.subr.bf16.mxu1 %v1435_v7 }
 0x423   :  { %834 = vmatprep.mubr.bf16.mxu0 %v1389_v0  ;;  %875 = vmatprep.mubr.bf16.mxu1 %v1389_v0 }
 0x425   :  { %805 = vmatpush1.bf16.msra.mxu0 %v1432_v6  ;;  %846 = vmatpush1.bf16.msra.mxu1 %v1442_v9 }
 0x426   :  { %806 = vmatprep.subr.bf16.mxu0 %v1439_v8  ;;  %847 = vmatprep.subr.bf16.mxu1 %v1447_v11 }
 0x429   :  { %807 = vmatpush1.bf16.msra.mxu0 %v1444_v10  ;;  %848 = vmatpush1.bf16.msra.mxu1 %v1453_v13 }
 0x42a   :  { %808 = vmatprep.subr.bf16.mxu0 %v1450_v12  ;;  %849 = vmatprep.subr.bf16.mxu1 %v1456_v14 }
 0x42d   :  { %809 = vmatpush1.bf16.msra.mxu0 %v1459_v15  ;;  %850 = vmatpush1.bf16.msra.mxu1 %v1465_v17 }
 0x42e   :  { %810 = vmatprep.subr.bf16.mxu0 %v1462_v16  ;;  %851 = vmatprep.subr.bf16.mxu1 %v1468_v18 }
 0x431   :  { %811 = vmatpush1.bf16.msra.mxu0 %v1471_v19  ;;  %852 = vmatpush1.bf16.msra.mxu1 %v1477_v21 }
 0x432   :  { %812 = vmatprep.subr.bf16.mxu0 %v1474_v20  ;;  %853 = vmatprep.subr.bf16.mxu1 %v1480_v22 }
 0x435   :  { %813 = vmatpush1.bf16.msra.mxu0 %v1483_v23  ;;  %854 = vmatpush1.bf16.msra.mxu1 %v1489_v25 }
 0x436   :  { %814 = vmatprep.subr.bf16.mxu0 %v1486_v24  ;;  %855 = vmatprep.subr.bf16.mxu1 %v1492_v26 }
 0x439   :  { %815 = vmatpush1.bf16.msra.mxu0 %v1495_v27  ;;  %856 = vmatpush1.bf16.msra.mxu1 %v1501_v29 }
 0x43a   :  { %816 = vmatprep.subr.bf16.mxu0 %v1498_v28  ;;  %857 = vmatprep.subr.bf16.mxu1 %v1504_v30 }
 0x43d   :  { %817 = vmatpush1.bf16.msra.mxu0 %v1507_v31  ;;  %858 = vmatpush1.bf16.msra.mxu1 %v1511_v32 }
 0x43e   :  { %916 = vmatprep.subr.bf16.mxu0 %v1420_v1  ;;  %957 = vmatprep.subr.bf16.mxu1 %v1425_v3 }
 0x4f3   :  { %v722_v62 = vpop.f32.mrb[16].mxu0  ;;  %v763_v63 = vpop.f32.mrb[16].mxu1 }
 0x4f4   :  { %v770_v34 = vadd.f32 %v722_v62, %v684_v59  ;;  %v724_v35 = vpop.f32.mrb[17].mxu0  ;;  %v765_v37 = vpop.f32.mrb[17].mxu1  ;;  %v772_v46 = vadd.f32 %v763_v63, %v686_v45  ;;  %v1337_v45 = vld [vmem:[#allocation4 + $0x28] ss:$16 sps:$4 sm:$0xff]  }
 0x4f5   :  { %v771_v38 = vadd.f32 %v724_v35, %v685_v61  ;;  %v726_v1 = vpop.f32.mrb[18].mxu0  ;;  %v767_v39 = vpop.f32.mrb[18].mxu1  ;;  %v773_v44 = vadd.f32 %v765_v37, %v687_v36 }
 0x4f6   :  { %v774_v3 = vmul.f32 0.5, %v770_v34  ;;  %v727_v41 = vpop.f32.mrb[19].mxu0  ;;  %v768_v42 = vpop.f32.mrb[19].mxu1  ;;  %v776_v47 = vmul.f32 0.5, %v772_v46  ;;  %v1338_v46 = vld [vmem:[#allocation4 + $0x44] ss:$16 sps:$4 sm:$0xff]  }
 0x4f7   :  { %v775_v43 = vmul.f32 0.5, %v771_v38  ;;  %v1333_v41 = vld [vmem:[#allocation4 + $0x8] ss:$16 sps:$4 sm:$0xff]   ;;  %v1334_v42 = vld [vmem:[#allocation4 + $0x24] ss:$16 sps:$4 sm:$0xff]  }
 0x4f8   :  { %1290 = vtanh.f32 %v774_v3  ;;  %v1332_v3 = vld [vmem:[#allocation4] ss:$16 sps:$4 sm:$0xff]  }
 0x4f9   :  { %1292 = vtanh.f32 %v775_v43  ;;  %v1335_v43 = vld [vmem:[#allocation4 + $0x2c] ss:$16 sps:$4 sm:$0xff]  }
 0x4fa   :  { %1294 = vtanh.f32 %v773_v44  ;;  %v1336_v44 = vld [vmem:[#allocation4 + $0x20] ss:$16 sps:$4 sm:$0xff]  }
 0x4fb   :  { %1296 = vtanh.f32 %v776_v47  ;;  %v1339_v47 = vld [vmem:[#allocation4 + $0x4c] ss:$16 sps:$4 sm:$0xff]  }
 0x502   :  { %v1291_v48 = vpop.eup %1290 }
 0x503   :  { %v780_v49 = vadd.f32 1.0, %v1291_v48  ;;  %v1293_v50 = vpop.eup %1292  ;;  %v1340_v48 = vld [vmem:[#allocation4 + $0x40] ss:$16 sps:$4 sm:$0xff]  }
 0x504   :  { %v781_v52 = vadd.f32 1.0, %v1293_v50  ;;  %v1295_v53 = vpop.eup %1294  ;;  %v1342_v50 = vld [vmem:[#allocation4 + $0x64] ss:$16 sps:$4 sm:$0xff]  }
 0x505   :  { %v783_v51 = vmul.f32 0.5, %v780_v49  ;;  %v1297_v58 = vpop.eup %1296  ;;  %v1341_v49 = vld [vmem:[#allocation4 + $0x48] ss:$16 sps:$4 sm:$0xff]  }
 0x506   :  { %v784_v54 = vmul.f32 0.5, %v781_v52  ;;  %v782_v33 = vadd.f32 1.0, %v1297_v58  ;;  %v1344_v52 = vld [vmem:[#allocation4 + $0x60] ss:$16 sps:$4 sm:$0xff]   ;;  %v1351_v58 = vld [vmem:[#allocation4 + $0xac] ss:$16 sps:$4 sm:$0xff]  }
 0x507   :  { %v788_v55 = vmul.f32 %v1295_v53, %v783_v51  ;;  %v1343_v51 = vld [vmem:[#allocation4 + $0x6c] ss:$16 sps:$4 sm:$0xff]   ;;  %v1345_v53 = vld [vmem:[#allocation4 + $0x68] ss:$16 sps:$4 sm:$0xff]  }
 0x508   :  { %v787_v56 = vmul.f32 %v784_v54, %v1699_v40  ;;  %v785_v59 = vmul.f32 0.5, %v782_v33  ;;  %v1347_v54 = vld [vmem:[#allocation4 + $0x8c] ss:$16 sps:$4 sm:$0xff]   ;;  %v1352_v33 = vld [vmem:[#allocation4 + $0xa0] ss:$16 sps:$4 sm:$0xff]  }
 0x50a   :  { %v1746_v57 = vadd.f32 %v788_v55, %v787_v56  ;;  %v1348_v55 = vld [vmem:[#allocation4 + $0x80] ss:$16 sps:$4 sm:$0xff]   ;;  %v1349_v56 = vld [vmem:[#allocation4 + $0x88] ss:$16 sps:$4 sm:$0xff]  }
 0x50c   :  { %1298 = vtanh.f32 %v1746_v57 }
 0x516   :  { %v1299_v60 = vpop.eup %1298 }
 0x517   :  { %v791_v61 = vmul.f32 %v1299_v60, %v785_v59  ;;  %v1353_v59 = vld [vmem:[#allocation4 + $0xa8] ss:$16 sps:$4 sm:$0xff]   ;;  %v1354_v60 = vld [vmem:[#allocation4 + $0xc4] ss:$16 sps:$4 sm:$0xff]  }
 0x519   :  { %v792_v62 = vpack.c.bf16 %v791_v61, %v791_v61  ;;  %v1355_v61 = vld [vmem:[#allocation4 + $0xcc] ss:$16 sps:$4 sm:$0xff]  }
 0x51b   :  { %1187 = vst [vmem:[%s1820_s2 + $0x10] sm:$0xf] %v792_v62  ;;  %835 = vmatmul.mubr.bf16.vlgmr.msra.gmra.mrb[20].mxu0 %v792_v62  ;;  %876 = vmatmul.mubr.bf16.vlgmr.msra.gmra.mrb[20].mxu1 %v792_v62  ;;  %v1356_v62 = vld [vmem:[#allocation4 + $0xc0] ss:$16 sps:$4 sm:$0xff]  }
 0x51c   :  { %917 = vmatpush1.bf16.msra.mxu0 %v1422_v2  ;;  %958 = vmatpush1.bf16.msra.mxu1 %v1430_v5  ;;  %v1330_v2 = vld [vmem:[#allocation4 + $0x4] ss:$16 sps:$4 sm:$0xff]  }
 0x51d   :  { %918 = vmatprep.subr.bf16.mxu0 %v1428_v4  ;;  %959 = vmatprep.subr.bf16.mxu1 %v1435_v7  ;;  %v1331_v4 = vld [vmem:[#allocation4 + $0xc] ss:$16 sps:$4 sm:$0xff]   ;;  %v1188_v5 = vld [vmem:[%s1818_s0 + $0x50] sm:$0xff] }
 0x51e   :  { %948 = vmatprep.mubr.bf16.mxu0 %v1389_v0  ;;  %989 = vmatprep.mubr.bf16.mxu1 %v1389_v0  ;;  %v1189_v7 = vld [vmem:[%s1818_s0 + $0x58] sm:$0xff] }
 0x520   :  { %919 = vmatpush1.bf16.msra.mxu0 %v1432_v6  ;;  %960 = vmatpush1.bf16.msra.mxu1 %v1442_v9  ;;  %v798_v6 = vunpack.c.l.bf16 %v1188_v5 }
 0x521   :  { %920 = vmatprep.subr.bf16.mxu0 %v1439_v8  ;;  %961 = vmatprep.subr.bf16.mxu1 %v1447_v11  ;;  %v799_v8 = vunpack.c.h.bf16 %v1188_v5  ;;  %v1359_v5 = vld [vmem:[#allocation4 + $0xec] ss:$16 sps:$4 sm:$0xff]  }
 0x524   :  { %921 = vmatpush1.bf16.msra.mxu0 %v1444_v10  ;;  %962 = vmatpush1.bf16.msra.mxu1 %v1453_v13  ;;  %v801_v13 = vunpack.c.h.bf16 %v1189_v7 }
 0x525   :  { %922 = vmatprep.subr.bf16.mxu0 %v1450_v12  ;;  %963 = vmatprep.subr.bf16.mxu1 %v1456_v14 }
 0x528   :  { %923 = vmatpush1.bf16.msra.mxu0 %v1459_v15  ;;  %964 = vmatpush1.bf16.msra.mxu1 %v1465_v17 }
 0x529   :  { %924 = vmatprep.subr.bf16.mxu0 %v1462_v16  ;;  %965 = vmatprep.subr.bf16.mxu1 %v1468_v18 }
 0x52c   :  { %925 = vmatpush1.bf16.msra.mxu0 %v1471_v19  ;;  %966 = vmatpush1.bf16.msra.mxu1 %v1477_v21 }
 0x52d   :  { %926 = vmatprep.subr.bf16.mxu0 %v1474_v20  ;;  %967 = vmatprep.subr.bf16.mxu1 %v1480_v22 }
 0x530   :  { %927 = vmatpush1.bf16.msra.mxu0 %v1483_v23  ;;  %968 = vmatpush1.bf16.msra.mxu1 %v1489_v25  ;;  %v800_v23 = vunpack.c.l.bf16 %v1189_v7  ;;  %v1361_v7 = vld [vmem:[#allocation4 + $0xe8] ss:$16 sps:$4 sm:$0xff]  }
 0x531   :  { %928 = vmatprep.subr.bf16.mxu0 %v1486_v24  ;;  %969 = vmatprep.subr.bf16.mxu1 %v1492_v26 }
 0x534   :  { %929 = vmatpush1.bf16.msra.mxu0 %v1495_v27  ;;  %970 = vmatpush1.bf16.msra.mxu1 %v1501_v29 }
 0x535   :  { %930 = vmatprep.subr.bf16.mxu0 %v1498_v28  ;;  %971 = vmatprep.subr.bf16.mxu1 %v1504_v30 }
 0x538   :  { %931 = vmatpush1.bf16.msra.mxu0 %v1507_v31  ;;  %972 = vmatpush1.bf16.msra.mxu1 %v1511_v32 }
 0x539   :  { %1030 = vmatprep.subr.bf16.mxu0 %v1330_v2  ;;  %1071 = vmatprep.subr.bf16.mxu1 %v1331_v4  ;;  %v1357_v2 = vld [vmem:[#allocation4 + $0xc8] ss:$16 sps:$4 sm:$0xff]   ;;  %v1358_v4 = vld [vmem:[#allocation4 + $0xe4] ss:$16 sps:$4 sm:$0xff]  }
 0x5ee   :  { %v836_v9 = vpop.f32.mrb[20].mxu0  ;;  %v877_v10 = vpop.f32.mrb[20].mxu1 }
 0x5ef   :  { %v884_v11 = vadd.f32 %v836_v9, %v798_v6  ;;  %v838_v12 = vpop.f32.mrb[21].mxu0  ;;  %v879_v14 = vpop.f32.mrb[21].mxu1  ;;  %v886_v24 = vadd.f32 %v877_v10, %v800_v23  ;;  %v1360_v6 = vld [vmem:[#allocation4 + $0xe0] ss:$16 sps:$4 sm:$0xff]   ;;  %v1192_v10 = vld [vmem:[%s1818_s0 + $0x68] sm:$0xff] }
 0x5f0   :  { %v885_v15 = vadd.f32 %v838_v12, %v799_v8  ;;  %v840_v16 = vpop.f32.mrb[22].mxu0  ;;  %v881_v17 = vpop.f32.mrb[22].mxu1  ;;  %v887_v22 = vadd.f32 %v879_v14, %v801_v13  ;;  %v1191_v8 = vld [vmem:[%s1818_s0 + $0x60] sm:$0xff] }
 0x5f1   :  { %v888_v18 = vmul.f32 0.5, %v884_v11  ;;  %v841_v19 = vpop.f32.mrb[23].mxu0  ;;  %v882_v20 = vpop.f32.mrb[23].mxu1  ;;  %v890_v25 = vmul.f32 0.5, %v886_v24  ;;  %v912_v9 = vunpack.c.l.bf16 %v1191_v8  ;;  %v913_v11 = vunpack.c.h.bf16 %v1191_v8 }
 0x5f2   :  { %v889_v21 = vmul.f32 0.5, %v885_v15  ;;  %v915_v16 = vunpack.c.h.bf16 %v1192_v10 }
 0x5f3   :  { %1300 = vtanh.f32 %v888_v18 }
 0x5f4   :  { %1302 = vtanh.f32 %v889_v21 }
 0x5f5   :  { %1304 = vtanh.f32 %v887_v22 }
 0x5f6   :  { %1306 = vtanh.f32 %v890_v25 }
 0x5fd   :  { %v1301_v26 = vpop.eup %1300 }
 0x5fe   :  { %v894_v27 = vadd.f32 1.0, %v1301_v26  ;;  %v1303_v28 = vpop.eup %1302  ;;  %v914_v26 = vunpack.c.l.bf16 %v1192_v10 }
 0x5ff   :  { %v895_v30 = vadd.f32 1.0, %v1303_v28  ;;  %v1305_v31 = vpop.eup %1304 }
 0x600   :  { %v897_v29 = vmul.f32 0.5, %v894_v27  ;;  %v1307_v35 = vpop.eup %1306 }
 0x601   :  { %v898_v32 = vmul.f32 0.5, %v895_v30  ;;  %v896_v36 = vadd.f32 1.0, %v1307_v35 }
 0x602   :  { %v902_v40 = vmul.f32 %v1305_v31, %v897_v29 }
 0x603   :  { %v901_v63 = vmul.f32 %v898_v32, %v1746_v57  ;;  %v899_v37 = vmul.f32 0.5, %v896_v36  ;;  %v1350_v57 = vld [vmem:[#allocation4 + $0xa4] ss:$16 sps:$4 sm:$0xff]  }
 0x605   :  { %v1791_v34 = vadd.f32 %v902_v40, %v901_v63 }
 0x607   :  { %1308 = vtanh.f32 %v1791_v34 }
 0x611   :  { %v1309_v38 = vpop.eup %1308 }
 0x612   :  { %v905_v1 = vmul.f32 %v1309_v38, %v899_v37 }
 0x614   :  { %v906_v39 = vpack.c.bf16 %v905_v1, %v905_v1 }
 0x616   :  { %1190 = vst [vmem:[%s1820_s2 + $0x14] sm:$0xf] %v906_v39  ;;  %949 = vmatmul.mubr.bf16.vlgmr.msra.gmra.mrb[24].mxu0 %v906_v39  ;;  %990 = vmatmul.mubr.bf16.vlgmr.msra.gmra.mrb[24].mxu1 %v906_v39 }
 0x617   :  { %1031 = vmatpush1.bf16.msra.mxu0 %v1332_v3  ;;  %1072 = vmatpush1.bf16.msra.mxu1 %v1333_v41 }
 0x618   :  { %1032 = vmatprep.subr.bf16.mxu0 %v1334_v42  ;;  %1073 = vmatprep.subr.bf16.mxu1 %v1335_v43 }
 0x619   :  { %1062 = vmatprep.mubr.bf16.mxu0 %v1389_v0  ;;  %1103 = vmatprep.mubr.bf16.mxu1 %v1389_v0  ;;  %v1346_v0 = vld [vmem:[#allocation4 + $0x84] ss:$16 sps:$4 sm:$0xff]  }
 0x61b   :  { %1033 = vmatpush1.bf16.msra.mxu0 %v1336_v44  ;;  %1074 = vmatpush1.bf16.msra.mxu1 %v1337_v45  ;;  %v1194_v44 = vld [vmem:[%s1818_s0 + $0x70] sm:$0xff] }
 0x61c   :  { %1034 = vmatprep.subr.bf16.mxu0 %v1338_v46  ;;  %1075 = vmatprep.subr.bf16.mxu1 %v1339_v47  ;;  %v1026_v45 = vunpack.c.l.bf16 %v1194_v44  ;;  %v1027_v46 = vunpack.c.h.bf16 %v1194_v44 }
 0x61f   :  { %1035 = vmatpush1.bf16.msra.mxu0 %v1340_v48  ;;  %1076 = vmatpush1.bf16.msra.mxu1 %v1341_v49 }
 0x620   :  { %1036 = vmatprep.subr.bf16.mxu0 %v1342_v50  ;;  %1077 = vmatprep.subr.bf16.mxu1 %v1343_v51 }
 0x623   :  { %1037 = vmatpush1.bf16.msra.mxu0 %v1344_v52  ;;  %1078 = vmatpush1.bf16.msra.mxu1 %v1345_v53 }
 0x624   :  { %1038 = vmatprep.subr.bf16.mxu0 %v1346_v0  ;;  %1079 = vmatprep.subr.bf16.mxu1 %v1347_v54 }
 0x627   :  { %1039 = vmatpush1.bf16.msra.mxu0 %v1348_v55  ;;  %1080 = vmatpush1.bf16.msra.mxu1 %v1349_v56 }
 0x628   :  { %1040 = vmatprep.subr.bf16.mxu0 %v1350_v57  ;;  %1081 = vmatprep.subr.bf16.mxu1 %v1351_v58 }
 0x62b   :  { %1041 = vmatpush1.bf16.msra.mxu0 %v1352_v33  ;;  %1082 = vmatpush1.bf16.msra.mxu1 %v1353_v59 }
 0x62c   :  { %1042 = vmatprep.subr.bf16.mxu0 %v1354_v60  ;;  %1083 = vmatprep.subr.bf16.mxu1 %v1355_v61 }
 0x62f   :  { %1043 = vmatpush1.bf16.msra.mxu0 %v1356_v62  ;;  %1084 = vmatpush1.bf16.msra.mxu1 %v1357_v2 }
 0x630   :  { %1044 = vmatprep.subr.bf16.mxu0 %v1358_v4  ;;  %1085 = vmatprep.subr.bf16.mxu1 %v1359_v5 }
 0x633   :  { %1045 = vmatpush1.bf16.msra.mxu0 %v1360_v6  ;;  %1086 = vmatpush1.bf16.msra.mxu1 %v1361_v7 }
 0x6e9   :  { %v950_v12 = vpop.f32.mrb[24].mxu0  ;;  %v991_v13 = vpop.f32.mrb[24].mxu1 }
 0x6ea   :  { %v998_v14 = vadd.f32 %v950_v12, %v912_v9  ;;  %v952_v15 = vpop.f32.mrb[25].mxu0  ;;  %v993_v17 = vpop.f32.mrb[25].mxu1  ;;  %v1000_v27 = vadd.f32 %v991_v13, %v914_v26 }
 0x6eb   :  { %v999_v18 = vadd.f32 %v952_v15, %v913_v11  ;;  %v954_v19 = vpop.f32.mrb[26].mxu0  ;;  %v995_v20 = vpop.f32.mrb[26].mxu1  ;;  %v1001_v25 = vadd.f32 %v993_v17, %v915_v16 }
 0x6ec   :  { %v1002_v21 = vmul.f32 0.5, %v998_v14  ;;  %v955_v22 = vpop.f32.mrb[27].mxu0  ;;  %v996_v23 = vpop.f32.mrb[27].mxu1  ;;  %v1004_v28 = vmul.f32 0.5, %v1000_v27 }
 0x6ed   :  { %v1003_v24 = vmul.f32 0.5, %v999_v18 }
 0x6ee   :  { %1310 = vtanh.f32 %v1002_v21 }
 0x6ef   :  { %1312 = vtanh.f32 %v1003_v24 }
 0x6f0   :  { %1314 = vtanh.f32 %v1001_v25 }
 0x6f1   :  { %1316 = vtanh.f32 %v1004_v28 }
 0x6f8   :  { %v1311_v29 = vpop.eup %1310 }
 0x6f9   :  { %v1008_v30 = vadd.f32 1.0, %v1311_v29  ;;  %v1313_v31 = vpop.eup %1312 }
 0x6fa   :  { %v1009_v40 = vadd.f32 1.0, %v1313_v31  ;;  %v1315_v63 = vpop.eup %1314 }
 0x6fb   :  { %v1011_v32 = vmul.f32 0.5, %v1008_v30  ;;  %v1317_v1 = vpop.eup %1316 }
 0x6fc   :  { %v1012_v35 = vmul.f32 0.5, %v1009_v40  ;;  %v1010_v39 = vadd.f32 1.0, %v1317_v1 }
 0x6fd   :  { %v1016_v36 = vmul.f32 %v1315_v63, %v1011_v32 }
 0x6fe   :  { %v1015_v37 = vmul.f32 %v1012_v35, %v1791_v34  ;;  %v1013_v3 = vmul.f32 0.5, %v1010_v39  ;;  %v1195_v34 = vld [vmem:[%s1818_s0 + $0x78] sm:$0xff] }
 0x6ff   :  { %v1029_v51 = vunpack.c.h.bf16 %v1195_v34  ;;  %v1028_v59 = vunpack.c.l.bf16 %v1195_v34 }
 0x700   :  { %v1017_v38 = vadd.f32 %v1016_v36, %v1015_v37 }
 0x702   :  { %1318 = vtanh.f32 %v1017_v38 }
 0x70c   :  { %v1319_v41 = vpop.eup %1318 }
 0x70d   :  { %v1019_v42 = vmul.f32 %v1319_v41, %v1013_v3 }
 0x70f   :  { %v1020_v43 = vpack.c.bf16 %v1019_v42, %v1019_v42 }
 0x711   :  { %1193 = vst [vmem:[%s1820_s2 + $0x18] sm:$0xf] %v1020_v43  ;;  %1063 = vmatmul.mubr.bf16.vlgmr.msra.gmra.mrb[28].mxu0 %v1020_v43  ;;  %1104 = vmatmul.mubr.bf16.vlgmr.msra.gmra.mrb[28].mxu1 %v1020_v43 }
 0x7e4   :  { %v1064_v47 = vpop.f32.mrb[28].mxu0  ;;  %v1105_v48 = vpop.f32.mrb[28].mxu1 }
 0x7e5   :  { %v1112_v49 = vadd.f32 %v1064_v47, %v1026_v45  ;;  %v1066_v50 = vpop.f32.mrb[29].mxu0  ;;  %v1107_v52 = vpop.f32.mrb[29].mxu1  ;;  %v1114_v60 = vadd.f32 %v1105_v48, %v1028_v59 }
 0x7e6   :  { %v1113_v53 = vadd.f32 %v1066_v50, %v1027_v46  ;;  %v1068_v0 = vpop.f32.mrb[30].mxu0  ;;  %v1109_v54 = vpop.f32.mrb[30].mxu1  ;;  %v1115_v33 = vadd.f32 %v1107_v52, %v1029_v51 }
 0x7e7   :  { %v1116_v55 = vmul.f32 0.5, %v1112_v49  ;;  %v1069_v56 = vpop.f32.mrb[31].mxu0  ;;  %v1110_v57 = vpop.f32.mrb[31].mxu1  ;;  %v1118_v61 = vmul.f32 0.5, %v1114_v60 }
 0x7e8   :  { %v1117_v58 = vmul.f32 0.5, %v1113_v53 }
 0x7e9   :  { %1320 = vtanh.f32 %v1116_v55 }
 0x7ea   :  { %1322 = vtanh.f32 %v1117_v58 }
 0x7eb   :  { %1324 = vtanh.f32 %v1115_v33 }
 0x7ec   :  { %1326 = vtanh.f32 %v1118_v61 }
 0x7f3   :  { %v1321_v62 = vpop.eup %1320 }
 0x7f4   :  { %v1122_v2 = vadd.f32 1.0, %v1321_v62  ;;  %v1323_v4 = vpop.eup %1322 }
 0x7f5   :  { %v1123_v6 = vadd.f32 1.0, %v1323_v4  ;;  %v1325_v7 = vpop.eup %1324 }
 0x7f6   :  { %v1125_v5 = vmul.f32 0.5, %v1122_v2  ;;  %v1327_v12 = vpop.eup %1326 }
 0x7f7   :  { %v1126_v8 = vmul.f32 0.5, %v1123_v6  ;;  %v1124_v13 = vadd.f32 1.0, %v1327_v12 }
 0x7f8   :  { %v1130_v9 = vmul.f32 %v1325_v7, %v1125_v5 }
 0x7f9   :  { %v1129_v10 = vmul.f32 %v1126_v8, %v1017_v38  ;;  %v1127_v14 = vmul.f32 0.5, %v1124_v13 }
 0x7fb   :  { %v1131_v11 = vadd.f32 %v1130_v9, %v1129_v10 }
 0x7fd   :  { %1328 = vtanh.f32 %v1131_v11 }
 0x807   :  { %v1329_v15 = vpop.eup %1328 }
 0x808   :  { %v1133_v16 = vmul.f32 %v1329_v15, %v1127_v14 }
 0x80a   :  { %v1134_v17 = vpack.c.bf16 %v1133_v16, %v1133_v16 }
 0x80c   :  { %1196 = vst [vmem:[%s1820_s2 + $0x1c] sm:$0xf] %v1134_v17 }
 0x80d   :  { %1143 = vsyncpa [#allocation5], 1 }

// kernel: lstm_model_forward.5
= control target key start
LH: loop header
LB: loop body
LE: loop exit
PB: predicated region body
PF: predicated region fallthrough
CT: control target
= control target key end

     0   :  { %v1430_v1 = vmov 0.0   ;;  %vm1431_vm0 = vmmov 0   ;;  %s1764_s0 = inlined_call_operand.vmem [shape: bf16[8,8,128], index: 0, kind: input, shape index: {}]   ;;  %s1765_s1 = inlined_call_operand.vmem [shape: bf16[8,128,128], index: 1, kind: input, shape index: {}]   ;;  %s1766_s2 = inlined_call_operand.vmem [shape: f32[1,128], index: 2, kind: input, shape index: {}]   ;;  %s1767_s3 = inlined_call_operand.hbm [shape: f32[8,128], index: 3, kind: output, shape index: {}]  }
   0x1   :  { %v1338_v0 = vld [vmem:[%s1765_s1] sm:$0xff]   ;;  %1175 = vmatprep.subr.bf16.mxu0 %v1430_v1  ;;  %1195 = vmatprep.subr.bf16.mxu1 %v1430_v1  ;;  %v1340_v3 = vld [vmem:[%s1765_s1 + $0x8] sm:$0xff]   ;;  %v1342_v5 = vld [vmem:[%s1765_s1 + $0x10] sm:$0xff]  }
   0x2   :  { %v1339_v2 = vld [vmem:[%s1765_s1 + $0x40] sm:$0xff]   ;;  %1176 = vmatpush3.bf16.msra.mxu0 %v1338_v0  ;;  %1191 = vmatprep.mubr.msk.bf16.mxu0 %vm1431_vm0, %v1430_v1  ;;  %v1341_v4 = vld [vmem:[%s1765_s1 + $0x48] sm:$0xff]   ;;  %v1343_v6 = vld [vmem:[%s1765_s1 + $0x50] sm:$0xff]  }
   0x3   :  { %1196 = vmatpush3.bf16.msra.mxu1 %v1339_v2  ;;  %1177 = vmatprep.subr.bf16.mxu0 %v1430_v1  ;;  %v1344_v7 = vld [vmem:[%s1765_s1 + $0x18] sm:$0xff]   ;;  %v1346_v9 = vld [vmem:[%s1765_s1 + $0x20] sm:$0xff]   ;;  %v1348_v11 = vld [vmem:[%s1765_s1 + $0x28] sm:$0xff]  }
   0x4   :  { %1197 = vmatprep.subr.bf16.mxu1 %v1430_v1  ;;  %1211 = vmatprep.mubr.msk.bf16.mxu1 %vm1431_vm0, %v1430_v1  ;;  %v1345_v8 = vld [vmem:[%s1765_s1 + $0x58] sm:$0xff]   ;;  %v1347_v10 = vld [vmem:[%s1765_s1 + $0x60] sm:$0xff]   ;;  %v1349_v12 = vld [vmem:[%s1765_s1 + $0x68] sm:$0xff]  }
   0x5   :  { %v1350_v13 = vld [vmem:[%s1765_s1 + $0x30] sm:$0xff]   ;;  %v1352_v15 = vld [vmem:[%s1765_s1 + $0x38] sm:$0xff]   ;;  %v22_v17 = vld [vmem:[%s1764_s0] sm:$0xf] }
   0x6   :  { %1178 = vmatpush3.bf16.msra.mxu0 %v1340_v3  ;;  %v1351_v14 = vld [vmem:[%s1765_s1 + $0x70] sm:$0xff]   ;;  %v1353_v16 = vld [vmem:[%s1765_s1 + $0x78] sm:$0xff]   ;;  %v926_v18 = vld [vmem:[%s1764_s0 + $0x4] sm:$0xf] }
   0x7   :  { %1198 = vmatpush3.bf16.msra.mxu1 %v1341_v4  ;;  %1179 = vmatprep.subr.bf16.mxu0 %v1430_v1  ;;  %v1354_v19 = vld [vmem:[%s1765_s1 + $0x80] sm:$0xff]   ;;  %v1356_v21 = vld [vmem:[%s1765_s1 + $0x88] sm:$0xff]   ;;  %v1358_v23 = vld [vmem:[%s1765_s1 + $0x90] sm:$0xff]  }
   0x8   :  { %1199 = vmatprep.subr.bf16.mxu1 %v1430_v1  ;;  %v1355_v20 = vld [vmem:[%s1765_s1 + $0xc0] sm:$0xff]   ;;  %v1357_v22 = vld [vmem:[%s1765_s1 + $0xc8] sm:$0xff]   ;;  %v1359_v24 = vld [vmem:[%s1765_s1 + $0xd0] sm:$0xff]  }
   0x9   :  { %v1360_v25 = vld [vmem:[%s1765_s1 + $0x98] sm:$0xff]   ;;  %v1362_v27 = vld [vmem:[%s1765_s1 + $0xa0] sm:$0xff]   ;;  %v1364_v29 = vld [vmem:[%s1765_s1 + $0xa8] sm:$0xff]  }
   0xa   :  { %1180 = vmatpush3.bf16.msra.mxu0 %v1342_v5  ;;  %v1361_v26 = vld [vmem:[%s1765_s1 + $0xd8] sm:$0xff]   ;;  %v1363_v28 = vld [vmem:[%s1765_s1 + $0xe0] sm:$0xff]   ;;  %v1365_v30 = vld [vmem:[%s1765_s1 + $0xe8] sm:$0xff]  }
   0xb   :  { %1200 = vmatpush3.bf16.msra.mxu1 %v1343_v6  ;;  %1181 = vmatprep.subr.bf16.mxu0 %v1430_v1  ;;  %v1366_v31 = vld [vmem:[%s1765_s1 + $0xb0] sm:$0xff]   ;;  %v1368_v33 = vld [vmem:[%s1765_s1 + $0xb8] sm:$0xff]   ;;  %v951_v35 = vld [vmem:[%s1764_s0 + $0x8] sm:$0xf] }
   0xc   :  { %1201 = vmatprep.subr.bf16.mxu1 %v1430_v1  ;;  %v1367_v32 = vld [vmem:[%s1765_s1 + $0xf0] sm:$0xff]   ;;  %v1369_v34 = vld [vmem:[%s1765_s1 + $0xf8] sm:$0xff]   ;;  %v976_v36 = vld [vmem:[%s1764_s0 + $0xc] sm:$0xf] }
   0xd   :  { %v1370_v37 = vld [vmem:[%s1765_s1 + $0x100] sm:$0xff]   ;;  %v1372_v39 = vld [vmem:[%s1765_s1 + $0x108] sm:$0xff]  }
   0xe   :  { %1182 = vmatpush3.bf16.msra.mxu0 %v1344_v7  ;;  %v1371_v38 = vld [vmem:[%s1765_s1 + $0x140] sm:$0xff]  }
   0xf   :  { %1202 = vmatpush3.bf16.msra.mxu1 %v1345_v8  ;;  %1183 = vmatprep.subr.bf16.mxu0 %v1430_v1 }
  0x10   :  { %1203 = vmatprep.subr.bf16.mxu1 %v1430_v1 }
  0x12   :  { %1184 = vmatpush3.bf16.msra.mxu0 %v1346_v9 }
  0x13   :  { %1204 = vmatpush3.bf16.msra.mxu1 %v1347_v10  ;;  %1185 = vmatprep.subr.bf16.mxu0 %v1430_v1 }
  0x14   :  { %1205 = vmatprep.subr.bf16.mxu1 %v1430_v1 }
  0x16   :  { %1186 = vmatpush3.bf16.msra.mxu0 %v1348_v11 }
  0x17   :  { %1206 = vmatpush3.bf16.msra.mxu1 %v1349_v12  ;;  %1187 = vmatprep.subr.bf16.mxu0 %v1430_v1 }
  0x18   :  { %1207 = vmatprep.subr.bf16.mxu1 %v1430_v1 }
  0x1a   :  { %1188 = vmatpush3.bf16.msra.mxu0 %v1350_v13 }
  0x1b   :  { %1208 = vmatpush3.bf16.msra.mxu1 %v1351_v14  ;;  %1189 = vmatprep.subr.bf16.mxu0 %v1430_v1 }
  0x1c   :  { %1209 = vmatprep.subr.bf16.mxu1 %v1430_v1 }
  0x1e   :  { %1190 = vmatpush3.bf16.msra.mxu0 %v1352_v15 }
  0x1f   :  { %1210 = vmatpush3.bf16.msra.mxu1 %v1353_v16  ;;  %1215 = vmatprep.subr.bf16.mxu0 %v1430_v1 }
  0x20   :  { %1235 = vmatprep.subr.bf16.mxu1 %v1430_v1 }
  0x21   :  { %1192 = vmatmul.mubr.bf16.vlgmr.msra.gmra.mrb[0].mxu0 %v22_v17 }
  0x22   :  { %1212 = vmatmul.mubr.bf16.vlgmr.msra.gmra.mrb[0].mxu1 %v926_v18  ;;  %1216 = vmatpush3.bf16.msra.mxu0 %v1354_v19 }
  0x23   :  { %1236 = vmatpush3.bf16.msra.mxu1 %v1355_v20  ;;  %1217 = vmatprep.subr.bf16.mxu0 %v1430_v1 }
  0x24   :  { %1237 = vmatprep.subr.bf16.mxu1 %v1430_v1  ;;  %1231 = vmatprep.mubr.msk.bf16.mxu0 %vm1431_vm0, %v1430_v1 }
  0x25   :  { %1251 = vmatprep.mubr.msk.bf16.mxu1 %vm1431_vm0, %v1430_v1 }
  0x26   :  { %1218 = vmatpush3.bf16.msra.mxu0 %v1356_v21 }
  0x27   :  { %1238 = vmatpush3.bf16.msra.mxu1 %v1357_v22  ;;  %1219 = vmatprep.subr.bf16.mxu0 %v1430_v1 }
  0x28   :  { %1239 = vmatprep.subr.bf16.mxu1 %v1430_v1 }
  0x2a   :  { %1220 = vmatpush3.bf16.msra.mxu0 %v1358_v23 }
  0x2b   :  { %1240 = vmatpush3.bf16.msra.mxu1 %v1359_v24  ;;  %1221 = vmatprep.subr.bf16.mxu0 %v1430_v1 }
  0x2c   :  { %1241 = vmatprep.subr.bf16.mxu1 %v1430_v1 }
  0x2e   :  { %1222 = vmatpush3.bf16.msra.mxu0 %v1360_v25 }
  0x2f   :  { %1242 = vmatpush3.bf16.msra.mxu1 %v1361_v26  ;;  %1223 = vmatprep.subr.bf16.mxu0 %v1430_v1 }
  0x30   :  { %1243 = vmatprep.subr.bf16.mxu1 %v1430_v1 }
  0x32   :  { %1224 = vmatpush3.bf16.msra.mxu0 %v1362_v27 }
  0x33   :  { %1244 = vmatpush3.bf16.msra.mxu1 %v1363_v28  ;;  %1225 = vmatprep.subr.bf16.mxu0 %v1430_v1 }
  0x34   :  { %1245 = vmatprep.subr.bf16.mxu1 %v1430_v1 }
  0x36   :  { %1226 = vmatpush3.bf16.msra.mxu0 %v1364_v29 }
  0x37   :  { %1246 = vmatpush3.bf16.msra.mxu1 %v1365_v30  ;;  %1227 = vmatprep.subr.bf16.mxu0 %v1430_v1 }
  0x38   :  { %1247 = vmatprep.subr.bf16.mxu1 %v1430_v1 }
  0x3a   :  { %1228 = vmatpush3.bf16.msra.mxu0 %v1366_v31 }
  0x3b   :  { %1248 = vmatpush3.bf16.msra.mxu1 %v1367_v32  ;;  %1229 = vmatprep.subr.bf16.mxu0 %v1430_v1 }
  0x3c   :  { %1249 = vmatprep.subr.bf16.mxu1 %v1430_v1 }
  0x3e   :  { %1230 = vmatpush3.bf16.msra.mxu0 %v1368_v33 }
  0x3f   :  { %1250 = vmatpush3.bf16.msra.mxu1 %v1369_v34  ;;  %1255 = vmatprep.subr.bf16.mxu0 %v1430_v1 }
  0x40   :  { %1275 = vmatprep.subr.bf16.mxu1 %v1430_v1 }
  0x41   :  { %1232 = vmatmul.mubr.bf16.vlgmr.msra.gmra.mrb[4].mxu0 %v951_v35 }
  0x42   :  { %1252 = vmatmul.mubr.bf16.vlgmr.msra.gmra.mrb[4].mxu1 %v976_v36  ;;  %1256 = vmatpush3.bf16.msra.mxu0 %v1370_v37 }
  0x43   :  { %8 = vsyncpa [#allocation4], 0  ;;  %1276 = vmatpush3.bf16.msra.mxu1 %v1371_v38  ;;  %1257 = vmatprep.subr.bf16.mxu0 %v1430_v1  ;;  %v1373_v40 = vld [vmem:[%s1765_s1 + $0x148] sm:$0xff]   ;;  %v1374_v41 = vld [vmem:[%s1765_s1 + $0x110] sm:$0xff]   ;;  %s1432_s21 = smov [#allocation3]  }
  0x44   :  { %1277 = vmatprep.subr.bf16.mxu1 %v1430_v1  ;;  %1271 = vmatprep.mubr.msk.bf16.mxu0 %vm1431_vm0, %v1430_v1  ;;  %v1375_v42 = vld [vmem:[%s1765_s1 + $0x150] sm:$0xff]   ;;  %v1376_v43 = vld [vmem:[%s1765_s1 + $0x118] sm:$0xff]   ;;  %v1378_v45 = vld [vmem:[%s1765_s1 + $0x120] sm:$0xff]   ;;  %s910_s22 = sshll.u32 %s1432_s21, 4  ;;  %s911_s22 = int_to_ptr.vmem [resolvable:$true] %s910_s22 }
  0x45   :  { %1291 = vmatprep.mubr.msk.bf16.mxu1 %vm1431_vm0, %v1430_v1  ;;  %v1377_v44 = vld [vmem:[%s1765_s1 + $0x158] sm:$0xff]   ;;  %v1379_v46 = vld [vmem:[%s1765_s1 + $0x160] sm:$0xff]   ;;  %v1380_v47 = vld [vmem:[%s1765_s1 + $0x128] sm:$0xff]   ;;  %s1406_s23 = scalar_lea.vmem %s911_s22, 128  ;;  %p1411_p1 = scmp.lt.s32.totalorder %s911_s22, %s911_s22 }
  0x46   :  { %1258 = vmatpush3.bf16.msra.mxu0 %v1372_v39  ;;  %v1381_v48 = vld [vmem:[%s1765_s1 + $0x168] sm:$0xff]   ;;  %v1382_v49 = vld [vmem:[%s1765_s1 + $0x130] sm:$0xff]   ;;  %v1384_v51 = vld [vmem:[%s1765_s1 + $0x138] sm:$0xff]   ;;  %p1407_p0 = scmp.ne.s32.totalorder %s911_s22, %s1406_s23  ;;  %p1412_p2 = scmp.lt.s32.totalorder %s1406_s23, %s1406_s23 }
  0x47   :  { %1278 = vmatpush3.bf16.msra.mxu1 %v1373_v40  ;;  %1259 = vmatprep.subr.bf16.mxu0 %v1430_v1  ;;  %v1383_v50 = vld [vmem:[%s1765_s1 + $0x170] sm:$0xff]   ;;  %v1385_v52 = vld [vmem:[%s1765_s1 + $0x178] sm:$0xff]   ;;  %v1386_v54 = vld [vmem:[%s1765_s1 + $0x180] sm:$0xff]  }
  0x48   :  { %1279 = vmatprep.subr.bf16.mxu1 %v1430_v1  ;;  %v1001_v53 = vld [vmem:[%s1764_s0 + $0x10] sm:$0xf]  ;;  %v1026_v55 = vld [vmem:[%s1764_s0 + $0x14] sm:$0xf]  ;;  %v1387_v56 = vld [vmem:[%s1765_s1 + $0x1c0] sm:$0xff]   ;;  %p1413_p3 = por %p1412_p2, %p1411_p1 }
  0x49   :  { %v1388_v57 = vld [vmem:[%s1765_s1 + $0x188] sm:$0xff]   ;;  %v1390_v59 = vld [vmem:[%s1765_s1 + $0x190] sm:$0xff]   ;;  %v1392_v61 = vld [vmem:[%s1765_s1 + $0x198] sm:$0xff]  }
  0x4a   :  { %1260 = vmatpush3.bf16.msra.mxu0 %v1374_v41  ;;  %v1389_v58 = vld [vmem:[%s1765_s1 + $0x1c8] sm:$0xff]   ;;  %v1391_v60 = vld [vmem:[%s1765_s1 + $0x1d0] sm:$0xff]   ;;  %v1393_v62 = vld [vmem:[%s1765_s1 + $0x1d8] sm:$0xff]   ;;  %p1414_p4 = pnand %p1413_p3, %p1407_p0 }
  0x4b   :  { %1280 = vmatpush3.bf16.msra.mxu1 %v1375_v42  ;;  %1261 = vmatprep.subr.bf16.mxu0 %v1430_v1  ;;  %v1394_v63 = vld [vmem:[%s1765_s1 + $0x1a0] sm:$0xff]   ;;  %v1396_v2 = vld [vmem:[%s1765_s1 + $0x1a8] sm:$0xff]   ;;  %v1398_v4 = vld [vmem:[%s1765_s1 + $0x1b0] sm:$0xff]  }
  0x4c   :  { %1281 = vmatprep.subr.bf16.mxu1 %v1430_v1  ;;  %v1395_v0 = vld [vmem:[%s1765_s1 + $0x1e0] sm:$0xff]   ;;  %v1397_v3 = vld [vmem:[%s1765_s1 + $0x1e8] sm:$0xff]   ;;  %v1399_v5 = vld [vmem:[%s1765_s1 + $0x1f0] sm:$0xff]  }
  0x4d   :  { %v1400_v6 = vld [vmem:[%s1765_s1 + $0x1b8] sm:$0xff]   ;;  %v1101_v42 = vld [vmem:[%s1766_s2] ss:$0 sm:$0xff] }
  0x4e   :  { %1262 = vmatpush3.bf16.msra.mxu0 %v1376_v43  ;;  %v1401_v7 = vld [vmem:[%s1765_s1 + $0x1f8] sm:$0xff]  }
  0x4f   :  { %1282 = vmatpush3.bf16.msra.mxu1 %v1377_v44  ;;  %1263 = vmatprep.subr.bf16.mxu0 %v1430_v1  ;;  %v1051_v8 = vld [vmem:[%s1764_s0 + $0x18] sm:$0xf]  ;;  %v1076_v9 = vld [vmem:[%s1764_s0 + $0x1c] sm:$0xf] }
  0x50   :  { %1283 = vmatprep.subr.bf16.mxu1 %v1430_v1 }
  0x52   :  { %1264 = vmatpush3.bf16.msra.mxu0 %v1378_v45 }
  0x53   :  { %1284 = vmatpush3.bf16.msra.mxu1 %v1379_v46  ;;  %1265 = vmatprep.subr.bf16.mxu0 %v1430_v1 }
  0x54   :  { %1285 = vmatprep.subr.bf16.mxu1 %v1430_v1 }
  0x56   :  { %1266 = vmatpush3.bf16.msra.mxu0 %v1380_v47 }
  0x57   :  { %1286 = vmatpush3.bf16.msra.mxu1 %v1381_v48  ;;  %1267 = vmatprep.subr.bf16.mxu0 %v1430_v1 }
  0x58   :  { %1287 = vmatprep.subr.bf16.mxu1 %v1430_v1 }
  0x5a   :  { %1268 = vmatpush3.bf16.msra.mxu0 %v1382_v49 }
  0x5b   :  { %1288 = vmatpush3.bf16.msra.mxu1 %v1383_v50  ;;  %1269 = vmatprep.subr.bf16.mxu0 %v1430_v1 }
  0x5c   :  { %1289 = vmatprep.subr.bf16.mxu1 %v1430_v1 }
  0x5e   :  { %1270 = vmatpush3.bf16.msra.mxu0 %v1384_v51 }
  0x5f   :  { %1290 = vmatpush3.bf16.msra.mxu1 %v1385_v52  ;;  %1295 = vmatprep.subr.bf16.mxu0 %v1430_v1 }
  0x60   :  { %1315 = vmatprep.subr.bf16.mxu1 %v1430_v1 }
  0x61   :  { %1272 = vmatmul.mubr.bf16.vlgmr.msra.gmra.mrb[8].mxu0 %v1001_v53 }
  0x62   :  { %1292 = vmatmul.mubr.bf16.vlgmr.msra.gmra.mrb[8].mxu1 %v1026_v55  ;;  %1296 = vmatpush3.bf16.msra.mxu0 %v1386_v54 }
  0x63   :  { %1316 = vmatpush3.bf16.msra.mxu1 %v1387_v56  ;;  %1297 = vmatprep.subr.bf16.mxu0 %v1430_v1 }
  0x64   :  { %1317 = vmatprep.subr.bf16.mxu1 %v1430_v1  ;;  %1311 = vmatprep.mubr.msk.bf16.mxu0 %vm1431_vm0, %v1430_v1 }
  0x65   :  { %1331 = vmatprep.mubr.msk.bf16.mxu1 %vm1431_vm0, %v1430_v1 }
  0x66   :  { %1298 = vmatpush3.bf16.msra.mxu0 %v1388_v57 }
  0x67   :  { %1318 = vmatpush3.bf16.msra.mxu1 %v1389_v58  ;;  %1299 = vmatprep.subr.bf16.mxu0 %v1430_v1 }
  0x68   :  { %1319 = vmatprep.subr.bf16.mxu1 %v1430_v1 }
  0x6a   :  { %1300 = vmatpush3.bf16.msra.mxu0 %v1390_v59 }
  0x6b   :  { %1320 = vmatpush3.bf16.msra.mxu1 %v1391_v60  ;;  %1301 = vmatprep.subr.bf16.mxu0 %v1430_v1 }
  0x6c   :  { %1321 = vmatprep.subr.bf16.mxu1 %v1430_v1 }
  0x6e   :  { %1302 = vmatpush3.bf16.msra.mxu0 %v1392_v61 }
  0x6f   :  { %1322 = vmatpush3.bf16.msra.mxu1 %v1393_v62  ;;  %1303 = vmatprep.subr.bf16.mxu0 %v1430_v1 }
  0x70   :  { %1323 = vmatprep.subr.bf16.mxu1 %v1430_v1 }
  0x72   :  { %1304 = vmatpush3.bf16.msra.mxu0 %v1394_v63 }
  0x73   :  { %1324 = vmatpush3.bf16.msra.mxu1 %v1395_v0  ;;  %1305 = vmatprep.subr.bf16.mxu0 %v1430_v1 }
  0x74   :  { %1325 = vmatprep.subr.bf16.mxu1 %v1430_v1 }
  0x76   :  { %1306 = vmatpush3.bf16.msra.mxu0 %v1396_v2 }
  0x77   :  { %1326 = vmatpush3.bf16.msra.mxu1 %v1397_v3  ;;  %1307 = vmatprep.subr.bf16.mxu0 %v1430_v1 }
  0x78   :  { %1327 = vmatprep.subr.bf16.mxu1 %v1430_v1 }
  0x7a   :  { %1308 = vmatpush3.bf16.msra.mxu0 %v1398_v4 }
  0x7b   :  { %1328 = vmatpush3.bf16.msra.mxu1 %v1399_v5  ;;  %1309 = vmatprep.subr.bf16.mxu0 %v1430_v1 }
  0x7c   :  { %1329 = vmatprep.subr.bf16.mxu1 %v1430_v1 }
  0x7e   :  { %1310 = vmatpush3.bf16.msra.mxu0 %v1400_v6 }
  0x7f   :  { %1330 = vmatpush3.bf16.msra.mxu1 %v1401_v7 }
  0x81   :  { %1312 = vmatmul.mubr.bf16.vlgmr.msra.gmra.mrb[12].mxu0 %v1051_v8 }
  0x82   :  { %1332 = vmatmul.mubr.bf16.vlgmr.msra.gmra.mrb[12].mxu1 %v1076_v9 }
  0xf4   :  { %v121_v10 = vpop.f32.mrb[0].mxu0 }
  0xf5   :  { %v229_v11 = vpop.f32.mrb[0].mxu1  ;;  %v1193_v12 = vpop.f32.mrb[1].mxu0 }
  0xf6   :  { %v235_v13 = vadd.f32 %v229_v11, %v121_v10  ;;  %v1213_v14 = vpop.f32.mrb[1].mxu1  ;;  %v124_v15 = vpop.f32.mrb[2].mxu0 }
  0xf7   :  { %v232_v16 = vpop.f32.mrb[2].mxu1  ;;  %v1194_v1 = vpop.f32.mrb[3].mxu0 }
  0xf8   :  { %v1214_v17 = vpop.f32.mrb[3].mxu1 }
 0x114   :  { %v337_v18 = vpop.f32.mrb[4].mxu0 }
 0x115   :  { %v343_v19 = vadd.f32 %v337_v18, %v235_v13  ;;  %v445_v20 = vpop.f32.mrb[4].mxu1  ;;  %v1233_v21 = vpop.f32.mrb[5].mxu0 }
 0x116   :  { %v1253_v22 = vpop.f32.mrb[5].mxu1  ;;  %v340_v23 = vpop.f32.mrb[6].mxu0 }
 0x117   :  { %v451_v24 = vadd.f32 %v445_v20, %v343_v19  ;;  %v448_v25 = vpop.f32.mrb[6].mxu1  ;;  %v1234_v26 = vpop.f32.mrb[7].mxu0 }
 0x118   :  { %v1254_v27 = vpop.f32.mrb[7].mxu1 }
 0x134   :  { %v553_v28 = vpop.f32.mrb[8].mxu0 }
 0x135   :  { %v559_v29 = vadd.f32 %v553_v28, %v451_v24  ;;  %v661_v30 = vpop.f32.mrb[8].mxu1  ;;  %v1273_v31 = vpop.f32.mrb[9].mxu0 }
 0x136   :  { %v1293_v32 = vpop.f32.mrb[9].mxu1  ;;  %v556_v33 = vpop.f32.mrb[10].mxu0 }
 0x137   :  { %v667_v34 = vadd.f32 %v661_v30, %v559_v29  ;;  %v664_v35 = vpop.f32.mrb[10].mxu1  ;;  %v1274_v36 = vpop.f32.mrb[11].mxu0 }
 0x138   :  { %v1294_v37 = vpop.f32.mrb[11].mxu1 }
 0x154   :  { %v769_v38 = vpop.f32.mrb[12].mxu0 }
 0x155   :  { %v775_v39 = vadd.f32 %v769_v38, %v667_v34  ;;  %v877_v40 = vpop.f32.mrb[12].mxu1  ;;  %v1313_v41 = vpop.f32.mrb[13].mxu0 }
 0x156   :  { %v1333_v43 = vpop.f32.mrb[13].mxu1  ;;  %v772_v44 = vpop.f32.mrb[14].mxu0 }
 0x157   :  { %v883_v45 = vadd.f32 %v877_v40, %v775_v39  ;;  %v880_v46 = vpop.f32.mrb[14].mxu1  ;;  %v1314_v47 = vpop.f32.mrb[15].mxu0 }
 0x158   :  { %v1334_v48 = vpop.f32.mrb[15].mxu1 }
 0x159   :  { %v896_v49 = vadd.f32 %v1101_v42, %v883_v45 }
 0x15b   :  { %v1102_v50 = vmul.f32 -1.442695, %v896_v49 }
 0x15d   :  { %1402 = vpow2.f32 %v1102_v50 }
 0x167   :  { %v1403_v51 = vpop.eup %1402 }
 0x168   :  { %v900_v52 = vadd.f32 1.0, %v1403_v51 }
 0x16a   :  { %1404 = vrcp.f32 %v900_v52 }
 0x174   :  { %v1405_v53 = vpop.eup %1404 }
 0x175   :  { %903 = vst [vmem:[#allocation3] sm:$0xff] %v1405_v53 }
 0x176   :  { %1417 = shalt.err (!%p1414_p4)
}
 0x177   :  { %s1418_s25 = scalar_lea.hbm %s1767_s3, 128 }
 0x178   :  { %p1419_p5 = scmp.ne.s32.totalorder %s1767_s3, %s1418_s25  ;;  %p1422_p6 = scmp.lt.u32.totalorder %s1418_s25, %s1767_s3 }
 0x17a   :  { %p1424_p7 = pnand %p1422_p6, %p1419_p5 }
 0x17c   :  { %1427 = shalt.err (!%p1424_p7)
}
 0x17d   :  { %913 = dma.vmem_to_hbm [thread:$0]  %s911_s22, 128, %s1767_s3, [#allocation4]  }
 0x17e   :  { %1428 = dma.done.wait [#allocation4], 128  }
 0x17f   :  { %1429 = vsyncadd [#allocation4], 4294967168 }
 0x180   :  { %917 = vsyncpa [#allocation4], 1 }

</bundles_post_ra>
